<compile_context>
chip_gen: v7x
topology: tpu7x:2x2x1
jax: 0.10.0
libtpu: 0.0.40
codegen_flags: <defaults>
</compile_context>

<pallas_src>
import jax
import jax.numpy as jnp
from jax.experimental import pallas as pl
from jax.experimental.pallas import tpu as pltpu


def _round_up(v, m):
    return (v + m - 1) // m * m


# ---------------------------------------------------------------------------
# Fused Pallas kernel (one grid step == one sample)
# ---------------------------------------------------------------------------
def _make_kernel(c_pad, rest_cfg, w_offsets, w_sizes, n_fc):
    """rest_cfg: tuple of (kernel_size, padding, l_in, l_out) for conv2..convN.

    w_offsets / w_sizes: static row offsets / sizes of each layer's weight
    block inside the consolidated weight slab (all multiples of c_pad, so
    every slice is sublane-aligned and free)."""
    n_rest = len(rest_cfg)

    def kernel(p_ref, w_ref, b_ref, o_ref):
        f32, bf16 = jnp.float32, jnp.bfloat16

        def w_block(i):                        # static, aligned ref slice
            return w_ref[w_offsets[i]:w_offsets[i] + w_sizes[i], :]

        def bias(i):                           # (1, c_pad) f32
            return b_ref[i:i + 1, :]

        # --- conv1: wrapper pre-packed im2col -> one 128-deep contraction ---
        y = jnp.dot(p_ref[0], w_block(0), preferred_element_type=f32)
        act = jnp.maximum(y + bias(0), 0.0)    # (L1, c_pad) f32

        # --- conv2..convN: zero-pad along L in registers, im2col as a lane-
        #     aligned concat of the K taps, one bf16 MXU matmul per layer -----
        zero_rows = {p: jnp.zeros((p, c_pad), f32)
                     for (_, p, _, _) in rest_cfg if p > 0}
        for li, (k, p, l_in, l_out) in enumerate(rest_cfg):
            layer = 1 + li
            if p > 0:
                padded = jnp.concatenate(
                    [zero_rows[p], act, zero_rows[p]], axis=0)  # (l_in+2p, C)
            else:
                padded = act
            patches = jnp.concatenate(
                [padded[t:t + l_out, :] for t in range(k)],
                axis=-1).astype(bf16)          # (l_out, k*c_pad)
            y = jnp.dot(patches, w_block(layer), preferred_element_type=f32)
            act = jnp.maximum(y + bias(layer), 0.0)

        # --- fused mean over length (f32, in registers) + MLP head ----------
        h = jnp.mean(act, axis=0, keepdims=True)          # (1, c_pad) f32
        for fi in range(n_fc):
            layer = 1 + n_rest + fi
            y = jnp.dot(h.astype(bf16), w_block(layer),
                        preferred_element_type=f32) + bias(layer)
            h = jnp.maximum(y, 0.0) if fi < n_fc - 1 else y

        o_ref[0] = h.astype(o_ref.dtype)       # lane-dense (1, c_pad) store

    return kernel


# ---------------------------------------------------------------------------
# Wrapper: parameter consolidation + pallas_call plumbing
# ---------------------------------------------------------------------------
def cnn1d_forward(x_ncl, params):
    """x_ncl: (N, n_features, L) as in PyTorch. Returns (N, n_targets)."""
    n_batch, c_in, length = x_ncl.shape
    convs, fcs = params["convs"], params["fcs"]
    n_targets = fcs[-1][0].shape[1]

    w1, b1, p1 = convs[0]
    k1, cin1, cout1 = w1.shape

    dims = ([c_in, k1 * cin1] + [w.shape[2] for (w, _, _) in convs]
            + [w.shape[1] for (w, _) in fcs] + [128])
    c_pad = _round_up(max(dims), 128)          # lane-dense channel width

    # --- conv1: pre-pack im2col in the wrapper (tiny, lane-dense tensor) ----
    l1 = length + 2 * p1 - k1 + 1
    x = jnp.transpose(x_ncl, (0, 2, 1)).astype(jnp.float32)      # (N, L, Cin)
    xp = jnp.pad(x, ((0, 0), (p1, p1), (0, 0)))
    patches1 = jnp.concatenate([xp[:, t:t + l1, :] for t in range(k1)],
                               axis=-1)                          # (N,L1,K*Cin)
    patches1 = jnp.pad(
        patches1, ((0, 0), (0, 0), (0, c_pad - k1 * cin1))).astype(jnp.bfloat16)

    # --- consolidate ALL parameters into one weight slab + one bias slab ----
    w_blocks, biases = [], []
    # conv1 weight in tight (K*Cin -> c_pad, Cout -> c_pad) im2col form.
    w_blocks.append(jnp.zeros((c_pad, c_pad), jnp.float32)
                    .at[:k1 * cin1, :cout1].set(w1.reshape(k1 * cin1, cout1)))
    biases.append(jnp.zeros((c_pad,), jnp.float32).at[:cout1].set(b1))

    rest_cfg, lcur = [], l1
    for (w, b, pad) in convs[1:]:
        k, cin, cout = w.shape
        wp = jnp.zeros((k, c_pad, c_pad), jnp.float32).at[:, :cin, :cout].set(w)
        w_blocks.append(wp.reshape(k * c_pad, c_pad))
        biases.append(jnp.zeros((c_pad,), jnp.float32).at[:cout].set(b))
        lout = lcur + 2 * pad - k + 1
        rest_cfg.append((k, pad, lcur, lout))
        lcur = lout

    for (w, b) in fcs:
        din, dout = w.shape
        w_blocks.append(jnp.zeros((c_pad, c_pad), jnp.float32)
                        .at[:din, :dout].set(w))
        biases.append(jnp.zeros((c_pad,), jnp.float32).at[:dout].set(b))

    w_slab = jnp.concatenate(w_blocks, axis=0).astype(jnp.bfloat16)
    b_slab = jnp.stack(biases, axis=0)                   # (n_layers, c_pad) f32

    w_sizes = tuple(int(blk.shape[0]) for blk in w_blocks)
    w_offsets, r = [], 0
    for s in w_sizes:
        w_offsets.append(r)
        r += s
    w_offsets, n_rows = tuple(w_offsets), r
    n_layers = len(biases)

    kernel = _make_kernel(c_pad, tuple(rest_cfg), w_offsets, w_sizes, len(fcs))

    out = pl.pallas_call(
        kernel,
        out_shape=jax.ShapeDtypeStruct((n_batch, 1, c_pad), jnp.float32),
        grid_spec=pltpu.PrefetchScalarGridSpec(
            num_scalar_prefetch=0,
            grid=(n_batch,),
            in_specs=[
                pl.BlockSpec((1, l1, c_pad), lambda s: (s, 0, 0)),   # patches
                pl.BlockSpec((n_rows, c_pad), lambda s: (0, 0)),     # weights
                pl.BlockSpec((n_layers, c_pad), lambda s: (0, 0)),   # biases
            ],
            out_specs=pl.BlockSpec((1, 1, c_pad), lambda s: (s, 0, 0)),
        ),
        compiler_params=pltpu.CompilerParams(
            dimension_semantics=("parallel",)),
    )(patches1, w_slab, b_slab)
    return out[:, 0, :n_targets]


# ---------------------------------------------------------------------------
# Parameter initialization (mirrors the PyTorch module's shapes / init style)
# ---------------------------------------------------------------------------
def init_params(key, n_features, n_targets, window_size, feature_dim=10,
                kernel_size=6):
    eps = 1e-5
    conv_specs = [
        (n_features, feature_dim, kernel_size),
        (feature_dim, 2 * feature_dim, 3),
        (2 * feature_dim, 2 * feature_dim, 3),
        (2 * feature_dim, 2 * feature_dim, 3),
        (2 * feature_dim, 4 * feature_dim, 3),
        (4 * feature_dim, window_size * feature_dim, 3),
    ]
    convs = []
    for i, (cin, cout, k) in enumerate(conv_specs):
        kw, kb = jax.random.split(jax.random.fold_in(key, i))
        fan_in, fan_out = cin * k, cout * k
        std = 0.1 * (2.0 / (fan_in + fan_out)) ** 0.5        # xavier_normal_(0.1)
        w = std * jax.random.normal(kw, (k, cin, cout), jnp.float32)
        bound = 1.0 / (fan_in ** 0.5)                        # Conv1d default bias
        b = jax.random.uniform(kb, (cout,), jnp.float32, -bound, bound)
        # Fold eval-mode BatchNorm1d (gamma=1, beta=0, mean=0, var=1) into conv.
        gamma = jnp.ones((cout,), jnp.float32)
        beta = jnp.zeros((cout,), jnp.float32)
        mean = jnp.zeros((cout,), jnp.float32)
        var = jnp.ones((cout,), jnp.float32)
        s = gamma / jnp.sqrt(var + eps)
        convs.append((w * s[None, None, :], (b - mean) * s + beta, k // 2))

    fc_dims = [(window_size * feature_dim, 8 * feature_dim),
               (8 * feature_dim, 8 * feature_dim),
               (8 * feature_dim, n_targets)]
    fcs = []
    for i, (din, dout) in enumerate(fc_dims):
        kw = jax.random.fold_in(key, 100 + i)
        w = 0.01 * jax.random.normal(kw, (din, dout), jnp.float32)  # normal(0,.01)
        b = jnp.zeros((dout,), jnp.float32)                         # constant_(0)
        fcs.append((w, b))
    return {"convs": convs, "fcs": fcs}


# ---------------------------------------------------------------------------
# Pure-JAX reference (f32, for validation only; runs through XLA, not Pallas)
# ---------------------------------------------------------------------------
def _reference_forward(x_ncl, params):
    x = jnp.transpose(x_ncl, (0, 2, 1)).astype(jnp.float32)   # (N, L, C)
    for (w, b, padding) in params["convs"]:
        k_sz = w.shape[0]
        l_out = x.shape[1] + 2 * padding - k_sz + 1
        xp = jnp.pad(x, ((0, 0), (padding, padding), (0, 0)))
        y = sum(jnp.einsum("nlc,co->nlo", xp[:, k:k + l_out, :], w[k])
                for k in range(k_sz)) + b
        x = jnp.maximum(y, 0.0)
    h = jnp.mean(x, axis=1)
    (w1, b1), (w2, b2), (w3, b3) = params["fcs"]
    h = jnp.maximum(h @ w1 + b1, 0.0)
    h = jnp.maximum(h @ w2 + b2, 0.0)
    return h @ w3 + b3


if __name__ == "__main__":
    N, n_features, L = 2, 4, 16
    n_targets, window_size, feature_dim = 3, 8, 10

    key = jax.random.PRNGKey(0)
    params = init_params(jax.random.fold_in(key, 1), n_features, n_targets,
                         window_size, feature_dim)
    x = jax.random.normal(jax.random.fold_in(key, 2),
                          (N, n_features, L), jnp.float32)

    out = jax.jit(lambda xx: cnn1d_forward(xx, params))(x)
    out = jax.block_until_ready(out)
    assert out.shape == (N, n_targets), out.shape
    assert bool(jnp.all(jnp.isfinite(out)))

    ref = _reference_forward(x, params)
    # bf16 matmul operands (f32 accumulation) vs f32 reference.
    assert bool(jnp.allclose(out, ref, rtol=5e-2, atol=1e-5)), (out, ref)
    print("KERNEL_OK")
</pallas_src>

<mosaic_0001>
module attributes {stable_mosaic.version = 11 : i64} {
  func.func @kernel(%arg0: i32, %arg1: memref<1x17x128xbf16, #tpu.memory_space<vmem>>, %arg2: memref<2432x128xbf16, #tpu.memory_space<vmem>>, %arg3: memref<9x128xf32, #tpu.memory_space<vmem>>, %arg4: memref<1x1x128xf32, #tpu.memory_space<vmem>>) attributes {dimension_semantics = [#tpu.dimension_semantics<parallel>], iteration_bounds = array<i64: 2>, scalar_prefetch = 0 : i64, scratch_operands = 0 : i64, tpu.core_type = #tpu.core_type<tc>, window_params = [{transform_indices = @transform_0, window_bounds = array<i64: 1, 17, 128>}, {pipeline_mode = #tpu.pipeline_mode<synchronous>, transform_indices = @transform_1, window_bounds = array<i64: 2432, 128>}, {pipeline_mode = #tpu.pipeline_mode<synchronous>, transform_indices = @transform_2, window_bounds = array<i64: 9, 128>}, {transform_indices = @transform_3, window_bounds = array<i64: 1, 1, 128>}]} {
    %c0 = arith.constant 0 : index
    %c0_0 = arith.constant 0 : index
    %c0_1 = arith.constant 0 : index
    %0 = vector.load %arg1[%c0, %c0_0, %c0_1] : memref<1x17x128xbf16, #tpu.memory_space<vmem>>, vector<1x17x128xbf16>
    %1 = vector.shape_cast %0 : vector<1x17x128xbf16> to vector<17x128xbf16>
    %c0_2 = arith.constant 0 : index
    %c0_3 = arith.constant 0 : index
    %2 = vector.load %arg2[%c0_2, %c0_3] : memref<2432x128xbf16, #tpu.memory_space<vmem>>, vector<128x128xbf16>
    %cst = arith.constant dense<0.000000e+00> : vector<17x128xf32>
    %3 = tpu.matmul %1, %2, %cst {dimension_numbers = #tpu.dot_dimension_numbers<[1], [0], [0], [1], [0, 0, 1, 1], [], []>} : vector<17x128xbf16>, vector<128x128xbf16>, vector<17x128xf32> -> vector<17x128xf32>
    %c0_4 = arith.constant 0 : index
    %c0_5 = arith.constant 0 : index
    %4 = vector.load %arg3[%c0_4, %c0_5] : memref<9x128xf32, #tpu.memory_space<vmem>>, vector<1x128xf32>
    %5 = vector.broadcast %4 : vector<1x128xf32> to vector<17x128xf32>
    %6 = arith.addf %3, %5 : vector<17x128xf32>
    %cst_6 = arith.constant 0.000000e+00 : f32
    %7 = vector.broadcast %cst_6 : f32 to vector<17x128xf32>
    %8 = arith.maximumf %6, %7 : vector<17x128xf32>
    %cst_7 = arith.constant 0.000000e+00 : f32
    %9 = vector.broadcast %cst_7 : f32 to vector<1x128xf32>
    %10 = tpu.concatenate %9, %8, %9 in 0 : vector<1x128xf32>, vector<17x128xf32>, vector<1x128xf32> -> vector<19x128xf32>
    %11 = vector.extract_strided_slice %10 {offsets = [0, 0], sizes = [17, 128], strides = [1, 1]} : vector<19x128xf32> to vector<17x128xf32>
    %12 = vector.extract_strided_slice %10 {offsets = [1, 0], sizes = [17, 128], strides = [1, 1]} : vector<19x128xf32> to vector<17x128xf32>
    %13 = vector.extract_strided_slice %10 {offsets = [2, 0], sizes = [17, 128], strides = [1, 1]} : vector<19x128xf32> to vector<17x128xf32>
    %14 = tpu.concatenate %11, %12, %13 in 1 : vector<17x128xf32>, vector<17x128xf32>, vector<17x128xf32> -> vector<17x384xf32>
    %15 = arith.truncf %14 : vector<17x384xf32> to vector<17x384xbf16>
    %c128 = arith.constant 128 : index
    %c0_8 = arith.constant 0 : index
    %16 = vector.load %arg2[%c128, %c0_8] : memref<2432x128xbf16, #tpu.memory_space<vmem>>, vector<384x128xbf16>
    %cst_9 = arith.constant dense<0.000000e+00> : vector<17x128xf32>
    %17 = tpu.matmul %15, %16, %cst_9 {dimension_numbers = #tpu.dot_dimension_numbers<[1], [0], [0], [1], [0, 0, 1, 1], [], []>} : vector<17x384xbf16>, vector<384x128xbf16>, vector<17x128xf32> -> vector<17x128xf32>
    %c1 = arith.constant 1 : index
    %c0_10 = arith.constant 0 : index
    %18 = vector.load %arg3[%c1, %c0_10] : memref<9x128xf32, #tpu.memory_space<vmem>>, vector<1x128xf32>
    %19 = vector.broadcast %18 : vector<1x128xf32> to vector<17x128xf32>
    %20 = arith.addf %17, %19 : vector<17x128xf32>
    %cst_11 = arith.constant 0.000000e+00 : f32
    %21 = vector.broadcast %cst_11 : f32 to vector<17x128xf32>
    %22 = arith.maximumf %20, %21 : vector<17x128xf32>
    %23 = tpu.concatenate %9, %22, %9 in 0 : vector<1x128xf32>, vector<17x128xf32>, vector<1x128xf32> -> vector<19x128xf32>
    %24 = vector.extract_strided_slice %23 {offsets = [0, 0], sizes = [17, 128], strides = [1, 1]} : vector<19x128xf32> to vector<17x128xf32>
    %25 = vector.extract_strided_slice %23 {offsets = [1, 0], sizes = [17, 128], strides = [1, 1]} : vector<19x128xf32> to vector<17x128xf32>
    %26 = vector.extract_strided_slice %23 {offsets = [2, 0], sizes = [17, 128], strides = [1, 1]} : vector<19x128xf32> to vector<17x128xf32>
    %27 = tpu.concatenate %24, %25, %26 in 1 : vector<17x128xf32>, vector<17x128xf32>, vector<17x128xf32> -> vector<17x384xf32>
    %28 = arith.truncf %27 : vector<17x384xf32> to vector<17x384xbf16>
    %c512 = arith.constant 512 : index
    %c0_12 = arith.constant 0 : index
    %29 = vector.load %arg2[%c512, %c0_12] : memref<2432x128xbf16, #tpu.memory_space<vmem>>, vector<384x128xbf16>
    %cst_13 = arith.constant dense<0.000000e+00> : vector<17x128xf32>
    %30 = tpu.matmul %28, %29, %cst_13 {dimension_numbers = #tpu.dot_dimension_numbers<[1], [0], [0], [1], [0, 0, 1, 1], [], []>} : vector<17x384xbf16>, vector<384x128xbf16>, vector<17x128xf32> -> vector<17x128xf32>
    %c2 = arith.constant 2 : index
    %c0_14 = arith.constant 0 : index
    %31 = vector.load %arg3[%c2, %c0_14] : memref<9x128xf32, #tpu.memory_space<vmem>>, vector<1x128xf32>
    %32 = vector.broadcast %31 : vector<1x128xf32> to vector<17x128xf32>
    %33 = arith.addf %30, %32 : vector<17x128xf32>
    %cst_15 = arith.constant 0.000000e+00 : f32
    %34 = vector.broadcast %cst_15 : f32 to vector<17x128xf32>
    %35 = arith.maximumf %33, %34 : vector<17x128xf32>
    %36 = tpu.concatenate %9, %35, %9 in 0 : vector<1x128xf32>, vector<17x128xf32>, vector<1x128xf32> -> vector<19x128xf32>
    %37 = vector.extract_strided_slice %36 {offsets = [0, 0], sizes = [17, 128], strides = [1, 1]} : vector<19x128xf32> to vector<17x128xf32>
    %38 = vector.extract_strided_slice %36 {offsets = [1, 0], sizes = [17, 128], strides = [1, 1]} : vector<19x128xf32> to vector<17x128xf32>
    %39 = vector.extract_strided_slice %36 {offsets = [2, 0], sizes = [17, 128], strides = [1, 1]} : vector<19x128xf32> to vector<17x128xf32>
    %40 = tpu.concatenate %37, %38, %39 in 1 : vector<17x128xf32>, vector<17x128xf32>, vector<17x128xf32> -> vector<17x384xf32>
    %41 = arith.truncf %40 : vector<17x384xf32> to vector<17x384xbf16>
    %c896 = arith.constant 896 : index
    %c0_16 = arith.constant 0 : index
    %42 = vector.load %arg2[%c896, %c0_16] : memref<2432x128xbf16, #tpu.memory_space<vmem>>, vector<384x128xbf16>
    %cst_17 = arith.constant dense<0.000000e+00> : vector<17x128xf32>
    %43 = tpu.matmul %41, %42, %cst_17 {dimension_numbers = #tpu.dot_dimension_numbers<[1], [0], [0], [1], [0, 0, 1, 1], [], []>} : vector<17x384xbf16>, vector<384x128xbf16>, vector<17x128xf32> -> vector<17x128xf32>
    %c3 = arith.constant 3 : index
    %c0_18 = arith.constant 0 : index
    %44 = vector.load %arg3[%c3, %c0_18] : memref<9x128xf32, #tpu.memory_space<vmem>>, vector<1x128xf32>
    %45 = vector.broadcast %44 : vector<1x128xf32> to vector<17x128xf32>
    %46 = arith.addf %43, %45 : vector<17x128xf32>
    %cst_19 = arith.constant 0.000000e+00 : f32
    %47 = vector.broadcast %cst_19 : f32 to vector<17x128xf32>
    %48 = arith.maximumf %46, %47 : vector<17x128xf32>
    %49 = tpu.concatenate %9, %48, %9 in 0 : vector<1x128xf32>, vector<17x128xf32>, vector<1x128xf32> -> vector<19x128xf32>
    %50 = vector.extract_strided_slice %49 {offsets = [0, 0], sizes = [17, 128], strides = [1, 1]} : vector<19x128xf32> to vector<17x128xf32>
    %51 = vector.extract_strided_slice %49 {offsets = [1, 0], sizes = [17, 128], strides = [1, 1]} : vector<19x128xf32> to vector<17x128xf32>
    %52 = vector.extract_strided_slice %49 {offsets = [2, 0], sizes = [17, 128], strides = [1, 1]} : vector<19x128xf32> to vector<17x128xf32>
    %53 = tpu.concatenate %50, %51, %52 in 1 : vector<17x128xf32>, vector<17x128xf32>, vector<17x128xf32> -> vector<17x384xf32>
    %54 = arith.truncf %53 : vector<17x384xf32> to vector<17x384xbf16>
    %c1280 = arith.constant 1280 : index
    %c0_20 = arith.constant 0 : index
    %55 = vector.load %arg2[%c1280, %c0_20] : memref<2432x128xbf16, #tpu.memory_space<vmem>>, vector<384x128xbf16>
    %cst_21 = arith.constant dense<0.000000e+00> : vector<17x128xf32>
    %56 = tpu.matmul %54, %55, %cst_21 {dimension_numbers = #tpu.dot_dimension_numbers<[1], [0], [0], [1], [0, 0, 1, 1], [], []>} : vector<17x384xbf16>, vector<384x128xbf16>, vector<17x128xf32> -> vector<17x128xf32>
    %c4 = arith.constant 4 : index
    %c0_22 = arith.constant 0 : index
    %57 = vector.load %arg3[%c4, %c0_22] : memref<9x128xf32, #tpu.memory_space<vmem>>, vector<1x128xf32>
    %58 = vector.broadcast %57 : vector<1x128xf32> to vector<17x128xf32>
    %59 = arith.addf %56, %58 : vector<17x128xf32>
    %cst_23 = arith.constant 0.000000e+00 : f32
    %60 = vector.broadcast %cst_23 : f32 to vector<17x128xf32>
    %61 = arith.maximumf %59, %60 : vector<17x128xf32>
    %62 = tpu.concatenate %9, %61, %9 in 0 : vector<1x128xf32>, vector<17x128xf32>, vector<1x128xf32> -> vector<19x128xf32>
    %63 = vector.extract_strided_slice %62 {offsets = [0, 0], sizes = [17, 128], strides = [1, 1]} : vector<19x128xf32> to vector<17x128xf32>
    %64 = vector.extract_strided_slice %62 {offsets = [1, 0], sizes = [17, 128], strides = [1, 1]} : vector<19x128xf32> to vector<17x128xf32>
    %65 = vector.extract_strided_slice %62 {offsets = [2, 0], sizes = [17, 128], strides = [1, 1]} : vector<19x128xf32> to vector<17x128xf32>
    %66 = tpu.concatenate %63, %64, %65 in 1 : vector<17x128xf32>, vector<17x128xf32>, vector<17x128xf32> -> vector<17x384xf32>
    %67 = arith.truncf %66 : vector<17x384xf32> to vector<17x384xbf16>
    %c1664 = arith.constant 1664 : index
    %c0_24 = arith.constant 0 : index
    %68 = vector.load %arg2[%c1664, %c0_24] : memref<2432x128xbf16, #tpu.memory_space<vmem>>, vector<384x128xbf16>
    %cst_25 = arith.constant dense<0.000000e+00> : vector<17x128xf32>
    %69 = tpu.matmul %67, %68, %cst_25 {dimension_numbers = #tpu.dot_dimension_numbers<[1], [0], [0], [1], [0, 0, 1, 1], [], []>} : vector<17x384xbf16>, vector<384x128xbf16>, vector<17x128xf32> -> vector<17x128xf32>
    %c5 = arith.constant 5 : index
    %c0_26 = arith.constant 0 : index
    %70 = vector.load %arg3[%c5, %c0_26] : memref<9x128xf32, #tpu.memory_space<vmem>>, vector<1x128xf32>
    %71 = vector.broadcast %70 : vector<1x128xf32> to vector<17x128xf32>
    %72 = arith.addf %69, %71 : vector<17x128xf32>
    %cst_27 = arith.constant 0.000000e+00 : f32
    %73 = vector.broadcast %cst_27 : f32 to vector<17x128xf32>
    %74 = arith.maximumf %72, %73 : vector<17x128xf32>
    %cst_28 = arith.constant dense<0.000000e+00> : vector<128xf32>
    %75 = vector.multi_reduction <add>, %74, %cst_28 [0] : vector<17x128xf32> to vector<128xf32>
    %76 = vector.shape_cast %75 : vector<128xf32> to vector<1x128xf32>
    %cst_29 = arith.constant 1.700000e+01 : f32
    %77 = vector.broadcast %cst_29 : f32 to vector<1x128xf32>
    %78 = arith.divf %76, %77 : vector<1x128xf32>
    %79 = arith.truncf %78 : vector<1x128xf32> to vector<1x128xbf16>
    %c2048 = arith.constant 2048 : index
    %c0_30 = arith.constant 0 : index
    %80 = vector.load %arg2[%c2048, %c0_30] : memref<2432x128xbf16, #tpu.memory_space<vmem>>, vector<128x128xbf16>
    %cst_31 = arith.constant dense<0.000000e+00> : vector<1x128xf32>
    %81 = tpu.matmul %79, %80, %cst_31 {dimension_numbers = #tpu.dot_dimension_numbers<[1], [0], [0], [1], [0, 0, 1, 1], [], []>} : vector<1x128xbf16>, vector<128x128xbf16>, vector<1x128xf32> -> vector<1x128xf32>
    %c6 = arith.constant 6 : index
    %c0_32 = arith.constant 0 : index
    %82 = vector.load %arg3[%c6, %c0_32] : memref<9x128xf32, #tpu.memory_space<vmem>>, vector<1x128xf32>
    %83 = arith.addf %81, %82 : vector<1x128xf32>
    %cst_33 = arith.constant 0.000000e+00 : f32
    %84 = vector.broadcast %cst_33 : f32 to vector<1x128xf32>
    %85 = arith.maximumf %83, %84 : vector<1x128xf32>
    %86 = arith.truncf %85 : vector<1x128xf32> to vector<1x128xbf16>
    %c2176 = arith.constant 2176 : index
    %c0_34 = arith.constant 0 : index
    %87 = vector.load %arg2[%c2176, %c0_34] : memref<2432x128xbf16, #tpu.memory_space<vmem>>, vector<128x128xbf16>
    %cst_35 = arith.constant dense<0.000000e+00> : vector<1x128xf32>
    %88 = tpu.matmul %86, %87, %cst_35 {dimension_numbers = #tpu.dot_dimension_numbers<[1], [0], [0], [1], [0, 0, 1, 1], [], []>} : vector<1x128xbf16>, vector<128x128xbf16>, vector<1x128xf32> -> vector<1x128xf32>
    %c7 = arith.constant 7 : index
    %c0_36 = arith.constant 0 : index
    %89 = vector.load %arg3[%c7, %c0_36] : memref<9x128xf32, #tpu.memory_space<vmem>>, vector<1x128xf32>
    %90 = arith.addf %88, %89 : vector<1x128xf32>
    %cst_37 = arith.constant 0.000000e+00 : f32
    %91 = vector.broadcast %cst_37 : f32 to vector<1x128xf32>
    %92 = arith.maximumf %90, %91 : vector<1x128xf32>
    %93 = arith.truncf %92 : vector<1x128xf32> to vector<1x128xbf16>
    %c2304 = arith.constant 2304 : index
    %c0_38 = arith.constant 0 : index
    %94 = vector.load %arg2[%c2304, %c0_38] : memref<2432x128xbf16, #tpu.memory_space<vmem>>, vector<128x128xbf16>
    %cst_39 = arith.constant dense<0.000000e+00> : vector<1x128xf32>
    %95 = tpu.matmul %93, %94, %cst_39 {dimension_numbers = #tpu.dot_dimension_numbers<[1], [0], [0], [1], [0, 0, 1, 1], [], []>} : vector<1x128xbf16>, vector<128x128xbf16>, vector<1x128xf32> -> vector<1x128xf32>
    %c8 = arith.constant 8 : index
    %c0_40 = arith.constant 0 : index
    %96 = vector.load %arg3[%c8, %c0_40] : memref<9x128xf32, #tpu.memory_space<vmem>>, vector<1x128xf32>
    %97 = arith.addf %95, %96 : vector<1x128xf32>
    %c0_41 = arith.constant 0 : index
    %c0_42 = arith.constant 0 : index
    %c0_43 = arith.constant 0 : index
    %98 = vector.load %arg4[%c0_41, %c0_42, %c0_43] : memref<1x1x128xf32, #tpu.memory_space<vmem>>, vector<1x1x128xf32>
    %99 = vector.shape_cast %98 : vector<1x1x128xf32> to vector<1x128xf32>
    %100 = vector.shape_cast %97 : vector<1x128xf32> to vector<1x1x128xf32>
    tpu.vector_store %arg4[%c0_41, %c0_42, %c0_43], %100 {strides = array<i32>} : memref<1x1x128xf32, #tpu.memory_space<vmem>>, vector<1x1x128xf32>,
    return
  }
  func.func @transform_0(%arg0: i32) -> (i32, i32, i32) {
    %c0_i32 = arith.constant 0 : i32
    %c0_i32_0 = arith.constant 0 : i32
    %c0_i32_1 = arith.constant 0 : i32
    return %arg0, %c0_i32, %c0_i32_0 : i32, i32, i32
  }
  func.func @transform_1(%arg0: i32) -> (i32, i32) {
    %c0_i32 = arith.constant 0 : i32
    %c0_i32_0 = arith.constant 0 : i32
    %c0_i32_1 = arith.constant 0 : i32
    return %c0_i32, %c0_i32_0 : i32, i32
  }
  func.func @transform_2(%arg0: i32) -> (i32, i32) {
    %c0_i32 = arith.constant 0 : i32
    %c0_i32_0 = arith.constant 0 : i32
    %c0_i32_1 = arith.constant 0 : i32
    return %c0_i32, %c0_i32_0 : i32, i32
  }
  func.func @transform_3(%arg0: i32) -> (i32, i32, i32) {
    %c0_i32 = arith.constant 0 : i32
    %c0_i32_0 = arith.constant 0 : i32
    %c0_i32_1 = arith.constant 0 : i32
    return %arg0, %c0_i32, %c0_i32_0 : i32, i32, i32
  }
}

</mosaic_0001>

<bundles_post_ra>
// kernel: _lambda_.1
= control target key start
LH: loop header
LB: loop body
LE: loop exit
PB: predicated region body
PF: predicated region fallthrough
CT: control target
= control target key end

     0   :  { %8 = vsyncpa [#allocation3], 0  ;;  %s3611_s0 = inlined_call_operand.vmem [shape: bf16[2,17,128], index: 0, kind: input, shape index: {}]   ;;  %s3612_s1 = inlined_call_operand.hbm [shape: bf16[2432,128], index: 1, kind: input, shape index: {}]   ;;  %s3613_s2 = inlined_call_operand.vmem [shape: f32[9,128], index: 2, kind: input, shape index: {}]   ;;  %s3614_s3 = inlined_call_operand.hbm [shape: f32[2,1,128], index: 3, kind: output, shape index: {}]  }
   0x1   :  { %9 = vsyncpa [#allocation4], 0 }
   0x2   :  { %11 = vsyncpa [#allocation4 + $0x1], 0  ;;  %s3343_s12 = smov 0   ;;  %s3345_s13 = smov 0  }
   0x3   :  { %s3347_s14 = smov 0   ;;  %s3349_s15 = smov 0  }
   0x4 LB: > { %s3364_s16 = sadd.s32 4294967295, %s3314_s15   ;;  %s2398_s17 = sadd.s32 4294967294, %s3314_s15   ;;  %s3314_s15 = sphi %s3349_s15, %s3634_s15   ;;  %s3310_s14 = sphi %s3347_s14, %s3633_s14   ;;  %s3306_s13 = sphi %s3345_s13, %s3632_s13   ;;  %s3302_s12 = sphi %s3343_s12, %s3631_s12  }
   0x5   : > { %s3368_s18 = sadd.s32 1, %s3314_s15   ;;  %s92_s19 = sadd.s32 1, %s3310_s14 }
   0x6   : > { %s89_s20 = ssub.s32 %s3314_s15, %s3368_s18  ;;  %p102_p0 = scmp.ne.s32.totalorder %s3310_s14, %s3306_s13 }
   0x7   : > { %p90_p1 = scmp.eq.s32.totalorder %s89_s20, 0  ;;  %p103_p2 = scmp.eq.s32.totalorder %s3364_s16, 1 }
   0x8   : > { %p108_p3 = scmp.ne.s32.totalorder %s3306_s13, %s3302_s12  ;;  %p109_p4 = scmp.eq.s32.totalorder %s2398_s17, 1 }
   0x9   : > { %s3379_s21 = scalar_select %p90_p1, %s3310_s14, %s92_s19  }
   0xa   : > { %p3381_p5 = por %p103_p2, %p102_p0  ;;  %p3385_p6 = por %p109_p4, %p108_p3 }
   0xb   : > { %p2399_p7 = scmp.ge.s32.totalorder %s3314_s15, 1  ;;  %p116_p8 = scmp.lt.s32.totalorder %s3314_s15, 3 }
   0xc   : > { %s3618_s22 = scalar_select %p3381_p5, 1, 0 }
   0xd   : > { %s3619_s23 = scalar_select %p3385_p6, 1, 0 }
   0xe   : > { %p3615_p9 = scmp.eq.s32.totalorder %s3364_s16, 0  ;;  %p3392_p10 = pnand %p2399_p7, %p116_p8 }
   0xf   : > { %s3316_s25 = smov [#allocation2]   ;;  %s3220_s30 = scalar_lea.hbm %s3612_s1, 19456 }
  0x10   : > { %s3620_s24 = scalar_select %p3392_p10, 1, 0 }
  0x11   : > { %s128_s26 = sshll.u32 %s3316_s25, 4  ;;  %p3017_p11 = pneg %p3392_p10  ;;  %s129_s26 = int_to_ptr.vmem [resolvable:$true] %s128_s26 }
  0x12   : > { %p3221_p13 = scmp.ne.s32.totalorder %s3612_s1, %s3220_s30  ;;  %p3227_p3 = scmp.lt.u32.totalorder %s3220_s30, %s3612_s1 }
  0x13   : > { %p3400_p12 = pnand %p3615_p9, %p3017_p11 }
  0x15   : > { %p3222_p0 = pneg %p3400_p12 }
  0x17   : > { %p3223_p1 = pnand %p3222_p0, %p3221_p13 }
  0x19   : > { %p3224_p2 = pneg %p3223_p1 }
  0x1b   : > { %p3229_p4 = pnand %p3227_p3, %p3224_p2 }
  0x1d   : > { %3232 = shalt.err (!%p3229_p4)
}
  0x1e   : > { %s3233_s8 = scalar_lea.vmem %s129_s26, 19456  ;;  %p3241_p9 = scmp.lt.s32.totalorder %s129_s26, %s129_s26 }
  0x1f   : > { %p3234_p7 = scmp.ne.s32.totalorder %s129_s26, %s3233_s8  ;;  %p3242_p6 = scmp.lt.s32.totalorder %s3233_s8, %s3233_s8 }
  0x21   : > { %p3236_p8 = pnand %p3234_p7, %p3222_p0  ;;  %p3243_p5 = por %p3242_p6, %p3241_p9 }
  0x23   : > { %p3237_p11 = pneg %p3236_p8 }
  0x25   : > { %p3244_p10 = pnand %p3243_p5, %p3237_p11 }
  0x27   : > { %3247 = shalt.err (!%p3244_p10)
}
  0x28   : > { %s3317_s9 = smov 64   ;;  %s3318_s10 = smov 4  }
  0x29   : > { %3020 = dma.hbm_to_vmem [thread:$0]  (!%p3400_p12), %s3612_s1, 19456, %s129_s26, [#allocation3], %s3317_s9, %s3317_s9, %s3318_s10  }
  0x2a   : > { %p3622_p13 = scmp.ne.s32.totalorder %s3620_s24, 0 }
  0x2b   : > { %p3623_p1 = scmp.eq.s32.totalorder (!%p3622_p13), %s3364_s16, 0 }
  0x2c   : > { %155 = sbr.rel (%p3622_p13) target bundleno = 2182 (0x886), region = 32 }
  0x33   : > { %3293 = dma.done.wait (%p3623_p1), [#allocation3], 19456   ;;  %p3624_p0 = pmov %p3623_p1 }
  0x34   : > { %p178_p5 = scmp.lt.s32.totalorder %s3364_s16, 1  ;;  %v3066_v0 = vld [vmem:[#allocation2] sm:$0xff]   ;;  %v3067_v1 = vld [vmem:[#allocation2 + $0x8] sm:$0xff]   ;;  %v3068_v2 = vld [vmem:[#allocation2 + $0x10] sm:$0xff]   ;;  %vm320_vm0 = vcmask 1040384   ;;  %vm330_vm1 = vcmask 1041408  }
  0x35   : > { %3295 = vsyncadd (%p3624_p0), [#allocation3], 4294947840  ;;  %2830 = vmatprep.subr.bf16.mxu0 %v3066_v0  ;;  %v3069_v3 = vld [vmem:[#allocation2 + $0x18] sm:$0xff]   ;;  %v3076_v5 = vld [vmem:[#allocation2 + $0x80] sm:$0xff]   ;;  %vm334_vm2 = vcmask 1046528   ;;  %vm343_vm3 = vcmask 1045504  }
  0x36   : > { %s179_s19 = scalar_select %p178_p5, %s3364_s16, 1  ;;  %2831 = vmatpush3.bf16.msra.mxu0 %v3066_v0  ;;  %v3070_v6 = vld [vmem:[#allocation2 + $0x20] sm:$0xff]   ;;  %2613 = vmatprep.subr.bf16.mxu1 %v3076_v5  ;;  %v3079_v8 = vld [vmem:[#allocation2 + $0x88] sm:$0xff]   ;;  %v3082_v11 = vld [vmem:[#allocation2 + $0x90] sm:$0xff]   ;;  %vm3319_vm5 = vmmov 1   ;;  %vm3321_vm8 = vmmov 0  }
  0x37   : > { %2832 = vmatprep.subr.bf16.mxu0 %v3067_v1  ;;  %v3078_v7 = vld [vmem:[#allocation2 + $0x40] sm:$0xff]   ;;  %v3071_v9 = vld [vmem:[#allocation2 + $0x28] sm:$0xff]   ;;  %v3084_v12 = vld [vmem:[#allocation2 + $0x50] sm:$0xff]   ;;  %s176_s24 = sand.u32 1, %s3306_s13   ;;  %s2600_s28 = sshll.u32 %s3364_s16, 4 }
  0x38   : > { %s3010_s20 = smul.u32 12, %s179_s19  ;;  %2614 = vmatpush3.bf16.msra.mxu1 %v3078_v7  ;;  %v3081_v10 = vld [vmem:[#allocation2 + $0x48] sm:$0xff]   ;;  %v3085_v13 = vld [vmem:[#allocation2 + $0x98] sm:$0xff]   ;;  %v3072_v14 = vld [vmem:[#allocation2 + $0x30] sm:$0xff]   ;;  %s177_s29 = scalar_lea.vmem [#allocation5], %s176_s24 }
  0x39   : > { %2615 = vmatprep.subr.bf16.mxu1 %v3079_v8  ;;  %v3087_v15 = vld [vmem:[#allocation2 + $0x58] sm:$0xff]   ;;  %v3077_v17 = vld [vmem:[#allocation2 + $0xc0] sm:$0xff]   ;;  %v3080_v19 = vld [vmem:[#allocation2 + $0xc8] sm:$0xff]   ;;  %s2331_s30 = sshll.u32 %s177_s29, 4  ;;  %s3569_s6 = scalar_lea.hbm %s3614_s3, %s2600_s28  ;;  %s3571_s30 = int_to_ptr.vmem [resolvable:$true] %s2331_s30 }
  0x3a   : > { %s3431_s26 = scalar_lea.vmem %s3611_s0, %s3010_s20  ;;  %2833 = vmatpush3.bf16.msra.mxu0 %v3067_v1  ;;  %v3073_v16 = vld [vmem:[#allocation2 + $0x38] sm:$0xff]   ;;  %v3083_v20 = vld [vmem:[#allocation2 + $0xd0] sm:$0xff]   ;;  %v3088_v22 = vld [vmem:[#allocation2 + $0xa0] sm:$0xff]   ;;  %s2319_s7 = scalar_lea.sflag [#allocation4], %s176_s24 }
  0x3b   : > { %2834 = vmatprep.subr.bf16.mxu0 %v3068_v2  ;;  %v3074_v4 = vld [vmem:[%s3431_s26] sm:$0xff]   ;;  %v3075_v18 = vld [vmem:[%s3431_s26 + $0x8] ss:$0 sps:$4 sm:$0x11]   ;;  %v3086_v21 = vld [vmem:[#allocation2 + $0xd8] sm:$0xff]   ;;  %s3248_s16 = scalar_lea.vmem %s3571_s30, 16 }
  0x3c   : > { %2846 = vmatprep.mubr.bf16.mxu0 %v3074_v4  ;;  %2616 = vmatpush3.bf16.msra.mxu1 %v3081_v10  ;;  %v3089_v23 = vld [vmem:[#allocation2 + $0xe0] sm:$0xff]   ;;  %v3091_v25 = vld [vmem:[#allocation2 + $0xa8] sm:$0xff]   ;;  %v3094_v28 = vld [vmem:[#allocation2 + $0xb0] sm:$0xff]   ;;  %p3249_p6 = scmp.ne.s32.totalorder %s3571_s30, %s3248_s16  ;;  %p3629_p9 = scmp.ne.s32.totalorder %s3618_s22, 0 }
  0x3d   : > { %2617 = vmatprep.subr.bf16.mxu1 %v3082_v11  ;;  %v3090_v24 = vld [vmem:[#allocation2 + $0x60] sm:$0xff]   ;;  %v3092_v26 = vld [vmem:[#allocation2 + $0xe8] sm:$0xff]   ;;  %v3095_v29 = vld [vmem:[#allocation2 + $0xf0] sm:$0xff]   ;;  %s3322_s8 = smov [#allocation5]  }
  0x3e   : > { %2835 = vmatpush3.bf16.msra.mxu0 %v3068_v2  ;;  %v3093_v27 = vld [vmem:[#allocation2 + $0x68] sm:$0xff]   ;;  %v3096_v30 = vld [vmem:[#allocation2 + $0x70] sm:$0xff]   ;;  %v3097_v31 = vld [vmem:[#allocation2 + $0xb8] sm:$0xff]   ;;  %p3250_p10 = pnand %p3249_p6, %p3629_p9  ;;  %s3252_s9 = sshll.u32 %s3322_s8, 4  ;;  %s3253_s9 = int_to_ptr.vmem [resolvable:$false] %s3252_s9 }
  0x3f   : > { %2836 = vmatprep.subr.bf16.mxu0 %v3069_v3  ;;  %v3098_v32 = vld [vmem:[#allocation2 + $0xf8] sm:$0xff]   ;;  %v3100_v34 = vld [vmem:[#allocation2 + $0x140] sm:$0xff]   ;;  %vm2441_vm4 = vmneg %vm320_vm0  ;;  %s3254_s10 = scalar_lea.vmem %s3253_s9, 32  ;;  %p3255_p2 = scmp.lt.s32.totalorder %s3571_s30, %s3253_s9 }
  0x40   : > { %2618 = vmatpush3.bf16.msra.mxu1 %v3084_v12  ;;  %v3099_v33 = vld [vmem:[#allocation2 + $0x78] sm:$0xff]   ;;  %v3101_v35 = vld [vmem:[#allocation2 + $0x180] sm:$0xff]   ;;  %vm3447_vm6 = vmpackc.low %vm3319_vm5, %vm2441_vm4  ;;  %p3251_p12 = pneg %p3250_p10  ;;  %p3256_p3 = scmp.lt.s32.totalorder %s3254_s10, %s3248_s16 }
  0x41   : > { %2619 = vmatprep.subr.bf16.mxu1 %v3085_v13  ;;  %v2405_v36 = vld [vmem:[%s3613_s2] ss:$0 sm:$0xff]  ;;  %vm3455_vm7 = vmpackc.low %vm330_vm1, %vm330_vm1  ;;  %v3104_v10 = vld [vmem:[#allocation2 + $0x188] sm:$0xff]  }
  0x42   : > { %2837 = vmatpush3.bf16.msra.mxu0 %v3069_v3  ;;  %v3102_v4 = vld [vmem:[#allocation2 + $0x100] sm:$0xff]   ;;  %v3105_v11 = vld [vmem:[#allocation2 + $0x108] sm:$0xff]   ;;  %v3106_v12 = vld [vmem:[#allocation2 + $0x150] sm:$0xff]   ;;  %p3257_p4 = por %p3256_p3, %p3255_p2 }
  0x43   : > { %2838 = vmatprep.subr.bf16.mxu0 %v3070_v6  ;;  %v3107_v13 = vld [vmem:[#allocation2 + $0x190] sm:$0xff]   ;;  %v3200_v7 = vld [vmem:[#allocation2 + $0x420] sm:$0xff]  }
  0x44   : > { %2620 = vmatpush3.bf16.msra.mxu1 %v3087_v15  ;;  %v3109_v15 = vld [vmem:[#allocation2 + $0x158] sm:$0xff]   ;;  %v3198_v3 = vld [vmem:[#allocation2 + $0x410] sm:$0xff]   ;;  %p3258_p7 = pnand %p3257_p4, %p3251_p12 }
  0x45   : > { %2621 = vmatprep.subr.bf16.mxu1 %v3088_v22  ;;  %v3116_v22 = vld [vmem:[#allocation2 + $0x1a8] sm:$0xff]  }
  0x46   : > { %2839 = vmatpush3.bf16.msra.mxu0 %v3070_v6 }
  0x47   : > { %2840 = vmatprep.subr.bf16.mxu0 %v3071_v9 }
  0x48   : > { %2622 = vmatpush3.bf16.msra.mxu1 %v3090_v24  ;;  %v3118_v24 = vld [vmem:[#allocation2 + $0x170] sm:$0xff]  }
  0x49   : > { %2623 = vmatprep.subr.bf16.mxu1 %v3091_v25  ;;  %v3119_v25 = vld [vmem:[#allocation2 + $0x1b0] sm:$0xff]  }
  0x4a   : > { %2841 = vmatpush3.bf16.msra.mxu0 %v3071_v9  ;;  %v3103_v9 = vld [vmem:[#allocation2 + $0x148] sm:$0xff]  }
  0x4b   : > { %2842 = vmatprep.subr.bf16.mxu0 %v3072_v14 }
  0x4c   : > { %2624 = vmatpush3.bf16.msra.mxu1 %v3093_v27  ;;  %v3121_v27 = vld [vmem:[#allocation2 + $0x178] sm:$0xff]  }
  0x4d   : > { %2625 = vmatprep.subr.bf16.mxu1 %v3094_v28  ;;  %v3122_v28 = vld [vmem:[#allocation2 + $0x1b8] sm:$0xff]  }
  0x4e   : > { %2843 = vmatpush3.bf16.msra.mxu0 %v3072_v14  ;;  %v3108_v14 = vld [vmem:[#allocation2 + $0x110] sm:$0xff]  }
  0x4f   : > { %2844 = vmatprep.subr.bf16.mxu0 %v3073_v16 }
  0x50   : > { %2626 = vmatpush3.bf16.msra.mxu1 %v3096_v30  ;;  %v3124_v30 = vld [vmem:[#allocation2 + $0x200] sm:$0xff]  }
  0x51   : > { %2627 = vmatprep.subr.bf16.mxu1 %v3097_v31  ;;  %v3125_v31 = vld [vmem:[#allocation2 + $0x240] sm:$0xff]  }
  0x52   : > { %2845 = vmatpush3.bf16.msra.mxu0 %v3073_v16  ;;  %v3110_v16 = vld [vmem:[#allocation2 + $0x198] sm:$0xff]  }
  0x53   : > { %2850 = vmatprep.subr.bf16.mxu0 %v3077_v17 }
  0x54   : > { %2628 = vmatpush3.bf16.msra.mxu1 %v3099_v33 }
  0x55   : > { %2847 = vmatmul.mubr.bf16.vlgmr.msra.gmra.mrb[0].mxu0 %v3075_v18  ;;  %2651 = vmatprep.subr.bf16.mxu1 %v3100_v34  ;;  %v3112_v18 = vld [vmem:[#allocation2 + $0x160] sm:$0xff]  }
  0x56   : > { %2851 = vmatpush3.bf16.msra.mxu0 %v3077_v17  ;;  %v3111_v17 = vld [vmem:[#allocation2 + $0x118] sm:$0xff]  }
  0x57   : > { %2852 = vmatprep.subr.bf16.mxu0 %v3080_v19 }
  0x5a   : > { %2853 = vmatpush3.bf16.msra.mxu0 %v3080_v19  ;;  %v3113_v19 = vld [vmem:[#allocation2 + $0x1a0] sm:$0xff]  }
  0x5b   : > { %2854 = vmatprep.subr.bf16.mxu0 %v3083_v20 }
  0x5e   : > { %2855 = vmatpush3.bf16.msra.mxu0 %v3083_v20  ;;  %v3114_v20 = vld [vmem:[#allocation2 + $0x120] sm:$0xff]  }
  0x5f   : > { %2856 = vmatprep.subr.bf16.mxu0 %v3086_v21 }
  0x62   : > { %2857 = vmatpush3.bf16.msra.mxu0 %v3086_v21  ;;  %v3115_v21 = vld [vmem:[#allocation2 + $0x168] sm:$0xff]  }
  0x63   : > { %2858 = vmatprep.subr.bf16.mxu0 %v3089_v23 }
  0x66   : > { %2859 = vmatpush3.bf16.msra.mxu0 %v3089_v23  ;;  %v3117_v23 = vld [vmem:[#allocation2 + $0x128] sm:$0xff]  }
  0x67   : > { %2860 = vmatprep.subr.bf16.mxu0 %v3092_v26 }
  0x6a   : > { %2861 = vmatpush3.bf16.msra.mxu0 %v3092_v26  ;;  %v3120_v26 = vld [vmem:[#allocation2 + $0x130] sm:$0xff]  }
  0x6b   : > { %2862 = vmatprep.subr.bf16.mxu0 %v3095_v29 }
  0x6e   : > { %2863 = vmatpush3.bf16.msra.mxu0 %v3095_v29  ;;  %v3123_v29 = vld [vmem:[#allocation2 + $0x138] sm:$0xff]  }
  0x6f   : > { %2864 = vmatprep.subr.bf16.mxu0 %v3098_v32 }
  0x72   : > { %2865 = vmatpush3.bf16.msra.mxu0 %v3098_v32 }
  0x73   : > { %2870 = vmatprep.subr.bf16.mxu0 %v3101_v35 }
 0x128   : > { %v2848_v37 = vpop.f32.mrb[0].mxu0 }
 0x129   : > { %v309_v38 = vadd.f32 %v2848_v37, %v2405_v36  ;;  %v300_v39 = vpop.f32.mrb[1].mxu0 }
 0x12a   : > { %v301_v40 = vadd.f32 %v2405_v36, %v300_v39  ;;  %v2849_v41 = vpop.f32.mrb[2].mxu0 }
 0x12b   : > { %v303_v42 = vpop.f32.mrb[3].mxu0  ;;  %v316_v43 = vmax.f32 %v309_v38, 0.0 }
 0x12c   : > { %v314_v44 = vmax.f32 %v301_v40, 0.0  ;;  %v304_v45 = vadd.f32 %v2405_v36, %v303_v42 }
 0x12d   : > { %v324_v48 = vrot.slane %v316_v43, 7 }
 0x12e   : > { %v321_v46 = vrot.slane %v314_v44, 7  ;;  %v315_v47 = vmax.f32 %v304_v45, 0.0 }
 0x130   : > { %v329_v49 = vsel %vm320_vm0, 0.0, %v321_v46  ;;  %v322_v50 = vrot.slane %v315_v47, 7 }
 0x131   : > { %v344_v51 = vrot.slane %v329_v49, 2  ;;  %v335_v56 = vrot.slane %v329_v49, 1 }
 0x132   : > { %v323_v52 = vsel %vm320_vm0, %v321_v46, %v322_v50  ;;  %v325_v53 = vsel %vm320_vm0, %v322_v50, %v324_v48 }
 0x133   : > { %v345_v54 = vrot.slane %v323_v52, 2  ;;  %v331_v55 = vsel %vm330_vm1, %v325_v53, 0.0  ;;  %v336_v57 = vrot.slane %v323_v52, 1  ;;  %v2443_v60 = vpack.c.bf16 %v323_v52, %v321_v46 }
 0x134   : > { %v338_v58 = vrot.slane %v331_v55, 1  ;;  %v347_v59 = vrot.slane %v331_v55, 2  ;;  %v2446_v8 = vpack.c.bf16 %v325_v53, %v325_v53 }
 0x135   : > { %v337_v61 = vsel %vm334_vm2, %v335_v56, %v336_v57  ;;  %v346_v62 = vsel %vm343_vm3, %v344_v51, %v345_v54 }
 0x136   : > { %v339_v63 = vsel %vm334_vm2, %v336_v57, %v338_v58  ;;  %v348_v0 = vsel %vm343_vm3, %v345_v54, %v347_v59  ;;  %v357_v5 = vpack.c.bf16 %v347_v59, %v347_v59  ;;  %v356_v6 = vpack.c.bf16 %v338_v58, %v338_v58 }
 0x137   : > { %v353_v1 = vpack.c.bf16 %v339_v63, %v337_v61  ;;  %v354_v2 = vpack.c.bf16 %v348_v0, %v346_v62 }
 0x139   : > { %587 = vmatprep.mubr.bf16.mxu1 %v353_v1  ;;  %2866 = vmatprep.mubr.bf16.mxu0 %v354_v2 }
 0x13a   : > { %2444 = vmatmul.mubr.msk.bf16.vlgmr.msra.gmra.mrb[0].mxu1 %vm3447_vm6, %v2443_v60  ;;  %2867 = vmatmul.mubr.bf16.vlgmr.msra.gmra.mrb[4].mxu0 %v357_v5 }
 0x13b   : > { %595 = vmatprep.mubr.bf16.mxu1 %v356_v6  ;;  %2652 = vmatpush3.bf16.msra.mxu1 %v3102_v4 }
 0x13c   : > { %2871 = vmatpush3.bf16.msra.mxu0 %v3101_v35  ;;  %2653 = vmatprep.subr.bf16.mxu1 %v3103_v9  ;;  %v2416_v35 = vld [vmem:[%s3613_s2 + $0x1] ss:$0 sm:$0xff] }
 0x13d   : > { %2872 = vmatprep.subr.bf16.mxu0 %v3104_v10 }
 0x13f   : > { %2654 = vmatpush3.bf16.msra.mxu1 %v3105_v11 }
 0x140   : > { %2873 = vmatpush3.bf16.msra.mxu0 %v3104_v10  ;;  %2655 = vmatprep.subr.bf16.mxu1 %v3106_v12 }
 0x141   : > { %2874 = vmatprep.subr.bf16.mxu0 %v3107_v13 }
 0x142   : > { %2447 = vmatmul.mubr.msk.bf16.gmra.mrb[4].mxu1 %vm3455_vm7, %v2446_v8 }
 0x143   : > { %2656 = vmatpush3.bf16.msra.mxu1 %v3108_v14 }
 0x144   : > { %2875 = vmatpush3.bf16.msra.mxu0 %v3107_v13  ;;  %2657 = vmatprep.subr.bf16.mxu1 %v3109_v15  ;;  %v3126_v15 = vld [vmem:[#allocation2 + $0x1c0] sm:$0xff]  }
 0x145   : > { %2876 = vmatprep.subr.bf16.mxu0 %v3110_v16 }
 0x147   : > { %2658 = vmatpush3.bf16.msra.mxu1 %v3111_v17 }
 0x148   : > { %2877 = vmatpush3.bf16.msra.mxu0 %v3110_v16  ;;  %2659 = vmatprep.subr.bf16.mxu1 %v3112_v18 }
 0x149   : > { %2878 = vmatprep.subr.bf16.mxu0 %v3113_v19 }
 0x14b   : > { %2660 = vmatpush3.bf16.msra.mxu1 %v3114_v20  ;;  %v3128_v20 = vld [vmem:[#allocation2 + $0x248] sm:$0xff]  }
 0x14c   : > { %2879 = vmatpush3.bf16.msra.mxu0 %v3113_v19  ;;  %2661 = vmatprep.subr.bf16.mxu1 %v3115_v21  ;;  %v3127_v19 = vld [vmem:[#allocation2 + $0x208] sm:$0xff]  }
 0x14d   : > { %2880 = vmatprep.subr.bf16.mxu0 %v3116_v22  ;;  %v3129_v21 = vld [vmem:[#allocation2 + $0x1c8] sm:$0xff]  }
 0x14f   : > { %2662 = vmatpush3.bf16.msra.mxu1 %v3117_v23  ;;  %v3131_v23 = vld [vmem:[#allocation2 + $0x250] sm:$0xff]  }
 0x150   : > { %2881 = vmatpush3.bf16.msra.mxu0 %v3116_v22  ;;  %2663 = vmatprep.subr.bf16.mxu1 %v3118_v24  ;;  %v3130_v22 = vld [vmem:[#allocation2 + $0x210] sm:$0xff]  }
 0x151   : > { %2882 = vmatprep.subr.bf16.mxu0 %v3119_v25  ;;  %v3132_v24 = vld [vmem:[#allocation2 + $0x1d0] sm:$0xff]  }
 0x153   : > { %2664 = vmatpush3.bf16.msra.mxu1 %v3120_v26  ;;  %v3134_v26 = vld [vmem:[#allocation2 + $0x258] sm:$0xff]  }
 0x154   : > { %2883 = vmatpush3.bf16.msra.mxu0 %v3119_v25  ;;  %2665 = vmatprep.subr.bf16.mxu1 %v3121_v27  ;;  %v3133_v25 = vld [vmem:[#allocation2 + $0x218] sm:$0xff]  }
 0x155   : > { %2884 = vmatprep.subr.bf16.mxu0 %v3122_v28  ;;  %v3135_v27 = vld [vmem:[#allocation2 + $0x1d8] sm:$0xff]  }
 0x157   : > { %2666 = vmatpush3.bf16.msra.mxu1 %v3123_v29  ;;  %v3137_v29 = vld [vmem:[#allocation2 + $0x260] sm:$0xff]  }
 0x158   : > { %2885 = vmatpush3.bf16.msra.mxu0 %v3122_v28  ;;  %2689 = vmatprep.subr.bf16.mxu1 %v3124_v30  ;;  %v3136_v28 = vld [vmem:[#allocation2 + $0x220] sm:$0xff]  }
 0x159   : > { %2890 = vmatprep.subr.bf16.mxu0 %v3125_v31  ;;  %v3138_v30 = vld [vmem:[#allocation2 + $0x1e0] sm:$0xff]  }
 0x20d   : > { %v2629_v32 = vpop.f32.mrb[0].mxu1  ;;  %v2868_v33 = vpop.f32.mrb[4].mxu0 }
 0x20e   : > { %v2630_v34 = vpop.f32.mrb[1].mxu1  ;;  %v637_v36 = vpop.f32.mrb[5].mxu0 }
 0x20f   : > { %v2631_v37 = vadd.f32 %v2630_v34, %v2629_v32  ;;  %v2632_v38 = vpop.f32.mrb[2].mxu1  ;;  %v2869_v39 = vpop.f32.mrb[6].mxu0  ;;  %v3140_v32 = vld [vmem:[#allocation2 + $0x268] sm:$0xff]   ;;  %v3142_v34 = vld [vmem:[#allocation2 + $0x230] sm:$0xff]  }
 0x210   : > { %v2633_v40 = vpop.f32.mrb[3].mxu1  ;;  %v640_v41 = vpop.f32.mrb[7].mxu0  ;;  %v3147_v39 = vld [vmem:[#allocation2 + $0x1f8] sm:$0xff]  }
 0x211   : > { %v590_v42 = vadd.f32 %v2631_v37, %v2416_v35  ;;  %v2634_v43 = vadd.f32 %v2633_v40, %v2632_v38  ;;  %v3145_v37 = vld [vmem:[#allocation2 + $0x238] sm:$0xff]   ;;  %v3148_v40 = vld [vmem:[#allocation2 + $0x2c0] sm:$0xff]  }
 0x212   : > { %v3146_v38 = vld [vmem:[#allocation2 + $0x278] sm:$0xff]  }
 0x213   : > { %v638_v44 = vadd.f32 %v637_v36, %v590_v42  ;;  %v593_v45 = vadd.f32 %v2634_v43, %v2416_v35  ;;  %v3144_v36 = vld [vmem:[#allocation2 + $0x1f0] sm:$0xff]  }
 0x215   : > { %v651_v46 = vmax.f32 %v638_v44, 0.0  ;;  %v641_v47 = vadd.f32 %v640_v41, %v593_v45  ;;  %v2635_v48 = vpop.f32.mrb[4].mxu1  ;;  %v3149_v41 = vld [vmem:[#allocation2 + $0x300] sm:$0xff]  }
 0x216   : > { %v2636_v49 = vpop.f32.mrb[5].mxu1  ;;  %v2448_v45 = vld [vmem:[%s3613_s2 + $0x2] ss:$0 sm:$0xff] }
 0x217   : > { %v657_v50 = vrot.slane %v651_v46, 7  ;;  %v652_v51 = vmax.f32 %v641_v47, 0.0  ;;  %v2637_v52 = vadd.f32 %v2636_v49, %v2635_v48  ;;  %v2638_v53 = vpop.f32.mrb[6].mxu1 }
 0x218   : > { %v2639_v54 = vpop.f32.mrb[7].mxu1 }
 0x219   : > { %v665_v55 = vsel %vm320_vm0, 0.0, %v657_v50  ;;  %v658_v56 = vrot.slane %v652_v51, 7  ;;  %v598_v57 = vadd.f32 %v2637_v52, %v2416_v35  ;;  %v3143_v35 = vld [vmem:[#allocation2 + $0x270] sm:$0xff]  }
 0x21a   : > { %v669_v58 = vrot.slane %v665_v55, 1  ;;  %v677_v61 = vrot.slane %v665_v55, 2 }
 0x21b   : > { %v659_v59 = vsel %vm320_vm0, %v657_v50, %v658_v56  ;;  %v646_v60 = vadd.f32 %v2868_v33, %v598_v57  ;;  %v3141_v33 = vld [vmem:[#allocation2 + $0x1e8] sm:$0xff]  }
 0x21c   : > { %v670_v62 = vrot.slane %v659_v59, 1  ;;  %v678_v63 = vrot.slane %v659_v59, 2  ;;  %v2475_v0 = vpack.c.bf16 %v659_v59, %v657_v50 }
 0x21d   : > { %v653_v1 = vmax.f32 %v646_v60, 0.0 }
 0x21e   : > { %v671_v2 = vsel %vm334_vm2, %v669_v58, %v670_v62  ;;  %v679_v4 = vsel %vm343_vm3, %v677_v61, %v678_v63 }
 0x21f   : > { %v660_v5 = vrot.slane %v653_v1, 7 }
 0x221   : > { %v661_v6 = vsel %vm320_vm0, %v658_v56, %v660_v5 }
 0x222   : > { %v666_v8 = vsel %vm330_vm1, %v661_v6, 0.0  ;;  %v2478_v18 = vpack.c.bf16 %v661_v6, %v661_v6 }
 0x223   : > { %v672_v9 = vrot.slane %v666_v8, 1  ;;  %v680_v10 = vrot.slane %v666_v8, 2 }
 0x225   : > { %v673_v11 = vsel %vm334_vm2, %v670_v62, %v672_v9  ;;  %v681_v12 = vsel %vm343_vm3, %v678_v63, %v680_v10  ;;  %v690_v16 = vpack.c.bf16 %v680_v10, %v680_v10  ;;  %v689_v17 = vpack.c.bf16 %v672_v9, %v672_v9 }
 0x226   : > { %v686_v13 = vpack.c.bf16 %v673_v11, %v671_v2  ;;  %v687_v14 = vpack.c.bf16 %v681_v12, %v679_v4 }
 0x228   : > { %920 = vmatprep.mubr.bf16.mxu1 %v686_v13  ;;  %2886 = vmatprep.mubr.bf16.mxu0 %v687_v14 }
 0x229   : > { %2476 = vmatmul.mubr.msk.bf16.vlgmr.msra.gmra.mrb[8].mxu1 %vm3447_vm6, %v2475_v0  ;;  %2887 = vmatmul.mubr.bf16.vlgmr.msra.gmra.mrb[8].mxu0 %v690_v16 }
 0x22a   : > { %928 = vmatprep.mubr.bf16.mxu1 %v689_v17  ;;  %2690 = vmatpush3.bf16.msra.mxu1 %v3126_v15 }
 0x22b   : > { %2891 = vmatpush3.bf16.msra.mxu0 %v3125_v31  ;;  %2691 = vmatprep.subr.bf16.mxu1 %v3127_v19  ;;  %v3139_v31 = vld [vmem:[#allocation2 + $0x228] sm:$0xff]  }
 0x22c   : > { %2892 = vmatprep.subr.bf16.mxu0 %v3128_v20 }
 0x22e   : > { %2692 = vmatpush3.bf16.msra.mxu1 %v3129_v21 }
 0x22f   : > { %2893 = vmatpush3.bf16.msra.mxu0 %v3128_v20  ;;  %2693 = vmatprep.subr.bf16.mxu1 %v3130_v22 }
 0x230   : > { %2894 = vmatprep.subr.bf16.mxu0 %v3131_v23 }
 0x231   : > { %2479 = vmatmul.mubr.msk.bf16.gmra.mrb[12].mxu1 %vm3455_vm7, %v2478_v18 }
 0x232   : > { %2694 = vmatpush3.bf16.msra.mxu1 %v3132_v24 }
 0x233   : > { %2895 = vmatpush3.bf16.msra.mxu0 %v3131_v23  ;;  %2695 = vmatprep.subr.bf16.mxu1 %v3133_v25  ;;  %v3150_v25 = vld [vmem:[#allocation2 + $0x280] sm:$0xff]  }
 0x234   : > { %2896 = vmatprep.subr.bf16.mxu0 %v3134_v26 }
 0x236   : > { %2696 = vmatpush3.bf16.msra.mxu1 %v3135_v27 }
 0x237   : > { %2897 = vmatpush3.bf16.msra.mxu0 %v3134_v26  ;;  %2697 = vmatprep.subr.bf16.mxu1 %v3136_v28 }
 0x238   : > { %2898 = vmatprep.subr.bf16.mxu0 %v3137_v29 }
 0x23a   : > { %2698 = vmatpush3.bf16.msra.mxu1 %v3138_v30  ;;  %v3152_v30 = vld [vmem:[#allocation2 + $0x308] sm:$0xff]  }
 0x23b   : > { %2899 = vmatpush3.bf16.msra.mxu0 %v3137_v29  ;;  %2699 = vmatprep.subr.bf16.mxu1 %v3139_v31  ;;  %v3151_v29 = vld [vmem:[#allocation2 + $0x2c8] sm:$0xff]  }
 0x23c   : > { %2900 = vmatprep.subr.bf16.mxu0 %v3140_v32  ;;  %v3153_v31 = vld [vmem:[#allocation2 + $0x288] sm:$0xff]  }
 0x23e   : > { %2700 = vmatpush3.bf16.msra.mxu1 %v3141_v33  ;;  %v3155_v33 = vld [vmem:[#allocation2 + $0x310] sm:$0xff]  }
 0x23f   : > { %2901 = vmatpush3.bf16.msra.mxu0 %v3140_v32  ;;  %2701 = vmatprep.subr.bf16.mxu1 %v3142_v34  ;;  %v3154_v32 = vld [vmem:[#allocation2 + $0x2d0] sm:$0xff]  }
 0x240   : > { %2902 = vmatprep.subr.bf16.mxu0 %v3143_v35  ;;  %v3156_v34 = vld [vmem:[#allocation2 + $0x290] sm:$0xff]  }
 0x242   : > { %2702 = vmatpush3.bf16.msra.mxu1 %v3144_v36  ;;  %v3158_v36 = vld [vmem:[#allocation2 + $0x318] sm:$0xff]  }
 0x243   : > { %2903 = vmatpush3.bf16.msra.mxu0 %v3143_v35  ;;  %2703 = vmatprep.subr.bf16.mxu1 %v3145_v37  ;;  %v3157_v35 = vld [vmem:[#allocation2 + $0x2d8] sm:$0xff]  }
 0x244   : > { %2904 = vmatprep.subr.bf16.mxu0 %v3146_v38  ;;  %v3159_v37 = vld [vmem:[#allocation2 + $0x298] sm:$0xff]  }
 0x246   : > { %2704 = vmatpush3.bf16.msra.mxu1 %v3147_v39  ;;  %v3161_v39 = vld [vmem:[#allocation2 + $0x320] sm:$0xff]  }
 0x247   : > { %2905 = vmatpush3.bf16.msra.mxu0 %v3146_v38  ;;  %2727 = vmatprep.subr.bf16.mxu1 %v3148_v40  ;;  %v3160_v38 = vld [vmem:[#allocation2 + $0x2e0] sm:$0xff]  }
 0x248   : > { %2910 = vmatprep.subr.bf16.mxu0 %v3149_v41  ;;  %v3162_v40 = vld [vmem:[#allocation2 + $0x2a0] sm:$0xff]  }
 0x2fc   : > { %v2667_v42 = vpop.f32.mrb[8].mxu1  ;;  %v2888_v43 = vpop.f32.mrb[8].mxu0 }
 0x2fd   : > { %v2668_v44 = vpop.f32.mrb[9].mxu1  ;;  %v970_v46 = vpop.f32.mrb[9].mxu0 }
 0x2fe   : > { %v2669_v47 = vadd.f32 %v2668_v44, %v2667_v42  ;;  %v2670_v48 = vpop.f32.mrb[10].mxu1  ;;  %v2889_v49 = vpop.f32.mrb[10].mxu0  ;;  %v3164_v42 = vld [vmem:[#allocation2 + $0x328] sm:$0xff]   ;;  %v3166_v44 = vld [vmem:[#allocation2 + $0x2f0] sm:$0xff]  }
 0x2ff   : > { %v2671_v50 = vpop.f32.mrb[11].mxu1  ;;  %v973_v51 = vpop.f32.mrb[11].mxu0  ;;  %v3171_v49 = vld [vmem:[#allocation2 + $0x2b8] sm:$0xff]  }
 0x300   : > { %v923_v52 = vadd.f32 %v2669_v47, %v2448_v45  ;;  %v2672_v53 = vadd.f32 %v2671_v50, %v2670_v48  ;;  %v3169_v47 = vld [vmem:[#allocation2 + $0x2f8] sm:$0xff]   ;;  %v3172_v50 = vld [vmem:[#allocation2 + $0x380] sm:$0xff]  }
 0x301   : > { %v3170_v48 = vld [vmem:[#allocation2 + $0x338] sm:$0xff]  }
 0x302   : > { %v971_v54 = vadd.f32 %v970_v46, %v923_v52  ;;  %v926_v55 = vadd.f32 %v2672_v53, %v2448_v45  ;;  %v3168_v46 = vld [vmem:[#allocation2 + $0x2b0] sm:$0xff]  }
 0x304   : > { %v984_v56 = vmax.f32 %v971_v54, 0.0  ;;  %v974_v57 = vadd.f32 %v973_v51, %v926_v55  ;;  %v2673_v58 = vpop.f32.mrb[12].mxu1  ;;  %v3173_v51 = vld [vmem:[#allocation2 + $0x3c0] sm:$0xff]  }
 0x305   : > { %v2674_v59 = vpop.f32.mrb[13].mxu1  ;;  %v2480_v55 = vld [vmem:[%s3613_s2 + $0x3] ss:$0 sm:$0xff] }
 0x306   : > { %v990_v60 = vrot.slane %v984_v56, 7  ;;  %v985_v61 = vmax.f32 %v974_v57, 0.0  ;;  %v2675_v62 = vadd.f32 %v2674_v59, %v2673_v58  ;;  %v2676_v63 = vpop.f32.mrb[14].mxu1 }
 0x307   : > { %v2677_v0 = vpop.f32.mrb[15].mxu1 }
 0x308   : > { %v998_v1 = vsel %vm320_vm0, 0.0, %v990_v60  ;;  %v991_v2 = vrot.slane %v985_v61, 7  ;;  %v931_v4 = vadd.f32 %v2675_v62, %v2448_v45  ;;  %v3167_v45 = vld [vmem:[#allocation2 + $0x330] sm:$0xff]  }
 0x309   : > { %v1002_v5 = vrot.slane %v998_v1, 1  ;;  %v1010_v9 = vrot.slane %v998_v1, 2 }
 0x30a   : > { %v992_v6 = vsel %vm320_vm0, %v990_v60, %v991_v2  ;;  %v979_v8 = vadd.f32 %v2888_v43, %v931_v4  ;;  %v3165_v43 = vld [vmem:[#allocation2 + $0x2a8] sm:$0xff]  }
 0x30b   : > { %v1003_v10 = vrot.slane %v992_v6, 1  ;;  %v1011_v11 = vrot.slane %v992_v6, 2  ;;  %v2507_v12 = vpack.c.bf16 %v992_v6, %v990_v60 }
 0x30c   : > { %v986_v13 = vmax.f32 %v979_v8, 0.0 }
 0x30d   : > { %v1004_v14 = vsel %vm334_vm2, %v1002_v5, %v1003_v10  ;;  %v1012_v15 = vsel %vm343_vm3, %v1010_v9, %v1011_v11 }
 0x30e   : > { %v993_v16 = vrot.slane %v986_v13, 7 }
 0x310   : > { %v994_v17 = vsel %vm320_vm0, %v991_v2, %v993_v16 }
 0x311   : > { %v999_v18 = vsel %vm330_vm1, %v994_v17, 0.0  ;;  %v2510_v28 = vpack.c.bf16 %v994_v17, %v994_v17 }
 0x312   : > { %v1005_v19 = vrot.slane %v999_v18, 1  ;;  %v1013_v20 = vrot.slane %v999_v18, 2 }
 0x314   : > { %v1006_v21 = vsel %vm334_vm2, %v1003_v10, %v1005_v19  ;;  %v1014_v22 = vsel %vm343_vm3, %v1011_v11, %v1013_v20  ;;  %v1023_v26 = vpack.c.bf16 %v1013_v20, %v1013_v20  ;;  %v1022_v27 = vpack.c.bf16 %v1005_v19, %v1005_v19 }
 0x315   : > { %v1019_v23 = vpack.c.bf16 %v1006_v21, %v1004_v14  ;;  %v1020_v24 = vpack.c.bf16 %v1014_v22, %v1012_v15 }
 0x317   : > { %1253 = vmatprep.mubr.bf16.mxu1 %v1019_v23  ;;  %2906 = vmatprep.mubr.bf16.mxu0 %v1020_v24 }
 0x318   : > { %2508 = vmatmul.mubr.msk.bf16.vlgmr.msra.gmra.mrb[16].mxu1 %vm3447_vm6, %v2507_v12  ;;  %2907 = vmatmul.mubr.bf16.vlgmr.msra.gmra.mrb[12].mxu0 %v1023_v26 }
 0x319   : > { %1261 = vmatprep.mubr.bf16.mxu1 %v1022_v27  ;;  %2728 = vmatpush3.bf16.msra.mxu1 %v3150_v25 }
 0x31a   : > { %2911 = vmatpush3.bf16.msra.mxu0 %v3149_v41  ;;  %2729 = vmatprep.subr.bf16.mxu1 %v3151_v29  ;;  %v3163_v41 = vld [vmem:[#allocation2 + $0x2e8] sm:$0xff]  }
 0x31b   : > { %2912 = vmatprep.subr.bf16.mxu0 %v3152_v30 }
 0x31d   : > { %2730 = vmatpush3.bf16.msra.mxu1 %v3153_v31 }
 0x31e   : > { %2913 = vmatpush3.bf16.msra.mxu0 %v3152_v30  ;;  %2731 = vmatprep.subr.bf16.mxu1 %v3154_v32 }
 0x31f   : > { %2914 = vmatprep.subr.bf16.mxu0 %v3155_v33 }
 0x320   : > { %2511 = vmatmul.mubr.msk.bf16.gmra.mrb[20].mxu1 %vm3455_vm7, %v2510_v28 }
 0x321   : > { %2732 = vmatpush3.bf16.msra.mxu1 %v3156_v34 }
 0x322   : > { %2915 = vmatpush3.bf16.msra.mxu0 %v3155_v33  ;;  %2733 = vmatprep.subr.bf16.mxu1 %v3157_v35  ;;  %v3174_v35 = vld [vmem:[#allocation2 + $0x340] sm:$0xff]  }
 0x323   : > { %2916 = vmatprep.subr.bf16.mxu0 %v3158_v36 }
 0x325   : > { %2734 = vmatpush3.bf16.msra.mxu1 %v3159_v37 }
 0x326   : > { %2917 = vmatpush3.bf16.msra.mxu0 %v3158_v36  ;;  %2735 = vmatprep.subr.bf16.mxu1 %v3160_v38 }
 0x327   : > { %2918 = vmatprep.subr.bf16.mxu0 %v3161_v39 }
 0x329   : > { %2736 = vmatpush3.bf16.msra.mxu1 %v3162_v40  ;;  %v3176_v40 = vld [vmem:[#allocation2 + $0x3c8] sm:$0xff]  }
 0x32a   : > { %2919 = vmatpush3.bf16.msra.mxu0 %v3161_v39  ;;  %2737 = vmatprep.subr.bf16.mxu1 %v3163_v41  ;;  %v3175_v39 = vld [vmem:[#allocation2 + $0x388] sm:$0xff]  }
 0x32b   : > { %2920 = vmatprep.subr.bf16.mxu0 %v3164_v42  ;;  %v3177_v41 = vld [vmem:[#allocation2 + $0x348] sm:$0xff]  }
 0x32d   : > { %2738 = vmatpush3.bf16.msra.mxu1 %v3165_v43  ;;  %v3179_v43 = vld [vmem:[#allocation2 + $0x3d0] sm:$0xff]  }
 0x32e   : > { %2921 = vmatpush3.bf16.msra.mxu0 %v3164_v42  ;;  %2739 = vmatprep.subr.bf16.mxu1 %v3166_v44  ;;  %v3178_v42 = vld [vmem:[#allocation2 + $0x390] sm:$0xff]  }
 0x32f   : > { %2922 = vmatprep.subr.bf16.mxu0 %v3167_v45  ;;  %v3180_v44 = vld [vmem:[#allocation2 + $0x350] sm:$0xff]  }
 0x331   : > { %2740 = vmatpush3.bf16.msra.mxu1 %v3168_v46  ;;  %v3182_v46 = vld [vmem:[#allocation2 + $0x3d8] sm:$0xff]  }
 0x332   : > { %2923 = vmatpush3.bf16.msra.mxu0 %v3167_v45  ;;  %2741 = vmatprep.subr.bf16.mxu1 %v3169_v47  ;;  %v3181_v45 = vld [vmem:[#allocation2 + $0x398] sm:$0xff]  }
 0x333   : > { %2924 = vmatprep.subr.bf16.mxu0 %v3170_v48  ;;  %v3183_v47 = vld [vmem:[#allocation2 + $0x358] sm:$0xff]  }
 0x335   : > { %2742 = vmatpush3.bf16.msra.mxu1 %v3171_v49  ;;  %v3185_v49 = vld [vmem:[#allocation2 + $0x3e0] sm:$0xff]  }
 0x336   : > { %2925 = vmatpush3.bf16.msra.mxu0 %v3170_v48  ;;  %2765 = vmatprep.subr.bf16.mxu1 %v3172_v50  ;;  %v3184_v48 = vld [vmem:[#allocation2 + $0x3a0] sm:$0xff]  }
 0x337   : > { %2930 = vmatprep.subr.bf16.mxu0 %v3173_v51  ;;  %v3186_v50 = vld [vmem:[#allocation2 + $0x360] sm:$0xff]  }
 0x3eb   : > { %v2705_v52 = vpop.f32.mrb[16].mxu1  ;;  %v2908_v53 = vpop.f32.mrb[12].mxu0 }
 0x3ec   : > { %v2706_v54 = vpop.f32.mrb[17].mxu1  ;;  %v1303_v56 = vpop.f32.mrb[13].mxu0 }
 0x3ed   : > { %v2707_v57 = vadd.f32 %v2706_v54, %v2705_v52  ;;  %v2708_v58 = vpop.f32.mrb[18].mxu1  ;;  %v2909_v59 = vpop.f32.mrb[14].mxu0  ;;  %v3188_v52 = vld [vmem:[#allocation2 + $0x3e8] sm:$0xff]   ;;  %v3190_v54 = vld [vmem:[#allocation2 + $0x3b0] sm:$0xff]  }
 0x3ee   : > { %v2709_v60 = vpop.f32.mrb[19].mxu1  ;;  %v1306_v61 = vpop.f32.mrb[15].mxu0  ;;  %v3195_v59 = vld [vmem:[#allocation2 + $0x378] sm:$0xff]  }
 0x3ef   : > { %v1256_v62 = vadd.f32 %v2707_v57, %v2480_v55  ;;  %v2710_v63 = vadd.f32 %v2709_v60, %v2708_v58  ;;  %v3193_v57 = vld [vmem:[#allocation2 + $0x3b8] sm:$0xff]  }
 0x3f0   : > { %v3194_v58 = vld [vmem:[#allocation2 + $0x3f8] sm:$0xff]  }
 0x3f1   : > { %v1304_v0 = vadd.f32 %v1303_v56, %v1256_v62  ;;  %v1259_v1 = vadd.f32 %v2710_v63, %v2480_v55  ;;  %v3192_v56 = vld [vmem:[#allocation2 + $0x370] sm:$0xff]   ;;  %v2512_v63 = vld [vmem:[%s3613_s2 + $0x4] ss:$0 sm:$0xff] }
 0x3f3   : > { %v1317_v2 = vmax.f32 %v1304_v0, 0.0  ;;  %v1307_v4 = vadd.f32 %v1306_v61, %v1259_v1  ;;  %v2711_v5 = vpop.f32.mrb[20].mxu1 }
 0x3f4   : > { %v2712_v6 = vpop.f32.mrb[21].mxu1 }
 0x3f5   : > { %v1323_v8 = vrot.slane %v1317_v2, 7  ;;  %v1318_v9 = vmax.f32 %v1307_v4, 0.0  ;;  %v2713_v10 = vadd.f32 %v2712_v6, %v2711_v5  ;;  %v2714_v11 = vpop.f32.mrb[22].mxu1 }
 0x3f6   : > { %v2715_v12 = vpop.f32.mrb[23].mxu1 }
 0x3f7   : > { %v1331_v13 = vsel %vm320_vm0, 0.0, %v1323_v8  ;;  %v1324_v14 = vrot.slane %v1318_v9, 7  ;;  %v1264_v15 = vadd.f32 %v2713_v10, %v2480_v55  ;;  %v3191_v55 = vld [vmem:[#allocation2 + $0x3f0] sm:$0xff]  }
 0x3f8   : > { %v1335_v16 = vrot.slane %v1331_v13, 1  ;;  %v1343_v19 = vrot.slane %v1331_v13, 2 }
 0x3f9   : > { %v1325_v17 = vsel %vm320_vm0, %v1323_v8, %v1324_v14  ;;  %v1312_v18 = vadd.f32 %v2908_v53, %v1264_v15  ;;  %v3189_v53 = vld [vmem:[#allocation2 + $0x368] sm:$0xff]  }
 0x3fa   : > { %v1336_v20 = vrot.slane %v1325_v17, 1  ;;  %v1344_v21 = vrot.slane %v1325_v17, 2  ;;  %v2539_v22 = vpack.c.bf16 %v1325_v17, %v1323_v8 }
 0x3fb   : > { %v1319_v23 = vmax.f32 %v1312_v18, 0.0 }
 0x3fc   : > { %v1337_v24 = vsel %vm334_vm2, %v1335_v16, %v1336_v20  ;;  %v1345_v25 = vsel %vm343_vm3, %v1343_v19, %v1344_v21 }
 0x3fd   : > { %v1326_v26 = vrot.slane %v1319_v23, 7 }
 0x3ff   : > { %v1327_v27 = vsel %vm320_vm0, %v1324_v14, %v1326_v26 }
 0x400   : > { %v1332_v28 = vsel %vm330_vm1, %v1327_v27, 0.0  ;;  %v2542_v38 = vpack.c.bf16 %v1327_v27, %v1327_v27 }
 0x401   : > { %v1338_v29 = vrot.slane %v1332_v28, 1  ;;  %v1346_v30 = vrot.slane %v1332_v28, 2 }
 0x403   : > { %v1339_v31 = vsel %vm334_vm2, %v1336_v20, %v1338_v29  ;;  %v1347_v32 = vsel %vm343_vm3, %v1344_v21, %v1346_v30  ;;  %v1356_v36 = vpack.c.bf16 %v1346_v30, %v1346_v30  ;;  %v1355_v37 = vpack.c.bf16 %v1338_v29, %v1338_v29 }
 0x404   : > { %v1352_v33 = vpack.c.bf16 %v1339_v31, %v1337_v24  ;;  %v1353_v34 = vpack.c.bf16 %v1347_v32, %v1345_v25 }
 0x406   : > { %1586 = vmatprep.mubr.bf16.mxu1 %v1352_v33  ;;  %2926 = vmatprep.mubr.bf16.mxu0 %v1353_v34 }
 0x407   : > { %2540 = vmatmul.mubr.msk.bf16.vlgmr.msra.gmra.mrb[24].mxu1 %vm3447_vm6, %v2539_v22  ;;  %2927 = vmatmul.mubr.bf16.vlgmr.msra.gmra.mrb[16].mxu0 %v1356_v36 }
 0x408   : > { %1594 = vmatprep.mubr.bf16.mxu1 %v1355_v37  ;;  %2766 = vmatpush3.bf16.msra.mxu1 %v3174_v35 }
 0x409   : > { %2931 = vmatpush3.bf16.msra.mxu0 %v3173_v51  ;;  %2767 = vmatprep.subr.bf16.mxu1 %v3175_v39  ;;  %v3187_v51 = vld [vmem:[#allocation2 + $0x3a8] sm:$0xff]  }
 0x40a   : > { %2932 = vmatprep.subr.bf16.mxu0 %v3176_v40 }
 0x40c   : > { %2768 = vmatpush3.bf16.msra.mxu1 %v3177_v41 }
 0x40d   : > { %2933 = vmatpush3.bf16.msra.mxu0 %v3176_v40  ;;  %2769 = vmatprep.subr.bf16.mxu1 %v3178_v42 }
 0x40e   : > { %2934 = vmatprep.subr.bf16.mxu0 %v3179_v43 }
 0x40f   : > { %2543 = vmatmul.mubr.msk.bf16.gmra.mrb[28].mxu1 %vm3455_vm7, %v2542_v38 }
 0x410   : > { %2770 = vmatpush3.bf16.msra.mxu1 %v3180_v44 }
 0x411   : > { %2935 = vmatpush3.bf16.msra.mxu0 %v3179_v43  ;;  %2771 = vmatprep.subr.bf16.mxu1 %v3181_v45 }
 0x412   : > { %2936 = vmatprep.subr.bf16.mxu0 %v3182_v46 }
 0x414   : > { %2772 = vmatpush3.bf16.msra.mxu1 %v3183_v47  ;;  %v3320_v47 = vmov 0.0  }
 0x415   : > { %2937 = vmatpush3.bf16.msra.mxu0 %v3182_v46  ;;  %2773 = vmatprep.subr.bf16.mxu1 %v3184_v48  ;;  %v3196_v46 = vld [vmem:[#allocation2 + $0x400] sm:$0xff]   ;;  %v3197_v48 = vld [vmem:[#allocation2 + $0x408] sm:$0xff]  }
 0x416   : > { %2938 = vmatprep.subr.bf16.mxu0 %v3185_v49 }
 0x418   : > { %2774 = vmatpush3.bf16.msra.mxu1 %v3186_v50  ;;  %v3201_v50 = vld [vmem:[#allocation2 + $0x428] sm:$0xff]  }
 0x419   : > { %2939 = vmatpush3.bf16.msra.mxu0 %v3185_v49  ;;  %2775 = vmatprep.subr.bf16.mxu1 %v3187_v51  ;;  %v3199_v49 = vld [vmem:[#allocation2 + $0x418] sm:$0xff]   ;;  %v3202_v51 = vld [vmem:[#allocation2 + $0x430] sm:$0xff]  }
 0x41a   : > { %2940 = vmatprep.subr.bf16.mxu0 %v3188_v52 }
 0x41c   : > { %2776 = vmatpush3.bf16.msra.mxu1 %v3189_v53  ;;  %v3204_v53 = vld [vmem:[#allocation2 + $0x440] sm:$0xff]  }
 0x41d   : > { %2941 = vmatpush3.bf16.msra.mxu0 %v3188_v52  ;;  %2777 = vmatprep.subr.bf16.mxu1 %v3190_v54  ;;  %v3203_v52 = vld [vmem:[#allocation2 + $0x438] sm:$0xff]   ;;  %v3205_v54 = vld [vmem:[#allocation2 + $0x448] sm:$0xff]  }
 0x41e   : > { %2942 = vmatprep.subr.bf16.mxu0 %v3191_v55 }
 0x420   : > { %2778 = vmatpush3.bf16.msra.mxu1 %v3192_v56  ;;  %v3207_v56 = vld [vmem:[#allocation2 + $0x458] sm:$0xff]  }
 0x421   : > { %2943 = vmatpush3.bf16.msra.mxu0 %v3191_v55  ;;  %2779 = vmatprep.subr.bf16.mxu1 %v3193_v57  ;;  %v3206_v55 = vld [vmem:[#allocation2 + $0x450] sm:$0xff]   ;;  %v3208_v57 = vld [vmem:[#allocation2 + $0x460] sm:$0xff]  }
 0x422   : > { %2944 = vmatprep.subr.bf16.mxu0 %v3194_v58 }
 0x424   : > { %2780 = vmatpush3.bf16.msra.mxu1 %v3195_v59 }
 0x425   : > { %2945 = vmatpush3.bf16.msra.mxu0 %v3194_v58  ;;  %2950 = vmatprep.subr.bf16.mxu1 %v3320_v47  ;;  %v3209_v58 = vld [vmem:[#allocation2 + $0x468] sm:$0xff]  }
 0x426   : > { %2970 = vmatprep.subr.bf16.mxu0 %v3320_v47 }
 0x4da   : > { %v2743_v60 = vpop.f32.mrb[24].mxu1  ;;  %v2928_v61 = vpop.f32.mrb[16].mxu0 }
 0x4db   : > { %v2744_v62 = vpop.f32.mrb[25].mxu1  ;;  %v1636_v0 = vpop.f32.mrb[17].mxu0 }
 0x4dc   : > { %v2745_v1 = vadd.f32 %v2744_v62, %v2743_v60  ;;  %v2746_v2 = vpop.f32.mrb[26].mxu1  ;;  %v2929_v4 = vpop.f32.mrb[18].mxu0  ;;  %v2544_v62 = vld [vmem:[%s3613_s2 + $0x5] ss:$0 sm:$0xff] }
 0x4dd   : > { %v2747_v5 = vpop.f32.mrb[27].mxu1  ;;  %v1639_v6 = vpop.f32.mrb[19].mxu0 }
 0x4de   : > { %v1589_v8 = vadd.f32 %v2745_v1, %v2512_v63  ;;  %v2748_v9 = vadd.f32 %v2747_v5, %v2746_v2 }
 0x4e0   : > { %v1637_v10 = vadd.f32 %v1636_v0, %v1589_v8  ;;  %v1592_v11 = vadd.f32 %v2748_v9, %v2512_v63 }
 0x4e2   : > { %v1650_v12 = vmax.f32 %v1637_v10, 0.0  ;;  %v1640_v13 = vadd.f32 %v1639_v6, %v1592_v11  ;;  %v2749_v14 = vpop.f32.mrb[28].mxu1 }
 0x4e3   : > { %v2750_v15 = vpop.f32.mrb[29].mxu1 }
 0x4e4   : > { %v1656_v16 = vrot.slane %v1650_v12, 7  ;;  %v1651_v17 = vmax.f32 %v1640_v13, 0.0  ;;  %v2751_v18 = vadd.f32 %v2750_v15, %v2749_v14  ;;  %v2752_v19 = vpop.f32.mrb[30].mxu1 }
 0x4e5   : > { %v2753_v20 = vpop.f32.mrb[31].mxu1 }
 0x4e6   : > { %v1664_v21 = vsel %vm320_vm0, 0.0, %v1656_v16  ;;  %v1657_v22 = vrot.slane %v1651_v17, 7  ;;  %v1597_v23 = vadd.f32 %v2751_v18, %v2512_v63 }
 0x4e7   : > { %v1668_v24 = vrot.slane %v1664_v21, 1  ;;  %v1676_v27 = vrot.slane %v1664_v21, 2 }
 0x4e8   : > { %v1658_v25 = vsel %vm320_vm0, %v1656_v16, %v1657_v22  ;;  %v1645_v26 = vadd.f32 %v2928_v61, %v1597_v23 }
 0x4e9   : > { %v1669_v28 = vrot.slane %v1658_v25, 1  ;;  %v1677_v29 = vrot.slane %v1658_v25, 2  ;;  %v2571_v30 = vpack.c.bf16 %v1658_v25, %v1656_v16 }
 0x4ea   : > { %v1652_v31 = vmax.f32 %v1645_v26, 0.0 }
 0x4eb   : > { %v1670_v32 = vsel %vm334_vm2, %v1668_v24, %v1669_v28  ;;  %v1678_v33 = vsel %vm343_vm3, %v1676_v27, %v1677_v29 }
 0x4ec   : > { %v1659_v34 = vrot.slane %v1652_v31, 7 }
 0x4ee   : > { %v1660_v35 = vsel %vm320_vm0, %v1657_v22, %v1659_v34  ;;  %v3211_v34 = vld [vmem:[#allocation2 + $0x478] sm:$0xff]  }
 0x4ef   : > { %v1665_v36 = vsel %vm330_vm1, %v1660_v35, 0.0  ;;  %v2574_v45 = vpack.c.bf16 %v1660_v35, %v1660_v35  ;;  %v3212_v35 = vld [vmem:[#allocation2 + $0x480] sm:$0xff]  }
 0x4f0   : > { %v1671_v37 = vrot.slane %v1665_v36, 1  ;;  %v1679_v38 = vrot.slane %v1665_v36, 2  ;;  %v3213_v36 = vld [vmem:[#allocation2 + $0x488] sm:$0xff]  }
 0x4f2   : > { %v1672_v39 = vsel %vm334_vm2, %v1669_v28, %v1671_v37  ;;  %v1680_v40 = vsel %vm343_vm3, %v1677_v29, %v1679_v38  ;;  %v1689_v43 = vpack.c.bf16 %v1679_v38, %v1679_v38  ;;  %v1688_v44 = vpack.c.bf16 %v1671_v37, %v1671_v37  ;;  %v3214_v37 = vld [vmem:[#allocation2 + $0x490] sm:$0xff]   ;;  %v3215_v38 = vld [vmem:[#allocation2 + $0x498] sm:$0xff]  }
 0x4f3   : > { %v1685_v41 = vpack.c.bf16 %v1672_v39, %v1670_v32  ;;  %v1686_v42 = vpack.c.bf16 %v1680_v40, %v1678_v33  ;;  %v3210_v33 = vld [vmem:[#allocation2 + $0x470] sm:$0xff]   ;;  %v3216_v39 = vld [vmem:[#allocation2 + $0x4a0] sm:$0xff]   ;;  %v3217_v40 = vld [vmem:[#allocation2 + $0x4a8] sm:$0xff]  }
 0x4f5   : > { %1919 = vmatprep.mubr.bf16.mxu1 %v1685_v41  ;;  %2946 = vmatprep.mubr.bf16.mxu0 %v1686_v42  ;;  %v2014_v41 = vld [vmem:[%s3613_s2 + $0x6] sm:$0x1] }
 0x4f6   : > { %2572 = vmatmul.mubr.msk.bf16.vlgmr.msra.gmra.mrb[32].mxu1 %vm3447_vm6, %v2571_v30  ;;  %2947 = vmatmul.mubr.bf16.vlgmr.msra.gmra.mrb[20].mxu0 %v1689_v43 }
 0x4f7   : > { %1927 = vmatprep.mubr.bf16.mxu1 %v1688_v44  ;;  %2951 = vmatpush3.bf16.msra.mxu1 %v3196_v46 }
 0x4f8   : > { %2952 = vmatprep.subr.bf16.mxu1 %v3320_v47  ;;  %2986 = vmatprep.mubr.msk.bf16.mxu0 %vm3321_vm8, %v3320_v47 }
 0x4f9   : > { %2971 = vmatpush3.bf16.msra.mxu0 %v3204_v53 }
 0x4fa   : > { %2972 = vmatprep.subr.bf16.mxu0 %v3320_v47 }
 0x4fb   : > { %2953 = vmatpush3.bf16.msra.mxu1 %v3197_v48 }
 0x4fc   : > { %2954 = vmatprep.subr.bf16.mxu1 %v3320_v47 }
 0x4fd   : > { %2973 = vmatpush3.bf16.msra.mxu0 %v3205_v54 }
 0x4fe   : > { %2575 = vmatmul.mubr.msk.bf16.gmra.mrb[36].mxu1 %vm3455_vm7, %v2574_v45  ;;  %2974 = vmatprep.subr.bf16.mxu0 %v3320_v47 }
 0x4ff   : > { %2955 = vmatpush3.bf16.msra.mxu1 %v3198_v3  ;;  %2966 = vmatprep.mubr.msk.bf16.mxu1 %vm3321_vm8, %v3320_v47 }
 0x500   : > { %2956 = vmatprep.subr.bf16.mxu1 %v3320_v47 }
 0x501   : > { %2975 = vmatpush3.bf16.msra.mxu0 %v3206_v55 }
 0x502   : > { %2976 = vmatprep.subr.bf16.mxu0 %v3320_v47 }
 0x503   : > { %2957 = vmatpush3.bf16.msra.mxu1 %v3199_v49  ;;  %v3218_v49 = vld [vmem:[#allocation2 + $0x4b0] sm:$0xff]  }
 0x504   : > { %2958 = vmatprep.subr.bf16.mxu1 %v3320_v47 }
 0x505   : > { %2977 = vmatpush3.bf16.msra.mxu0 %v3207_v56 }
 0x506   : > { %2978 = vmatprep.subr.bf16.mxu0 %v3320_v47 }
 0x507   : > { %2959 = vmatpush3.bf16.msra.mxu1 %v3200_v7  ;;  %v3219_v7 = vld [vmem:[#allocation2 + $0x4b8] sm:$0xff]  }
 0x508   : > { %2960 = vmatprep.subr.bf16.mxu1 %v3320_v47 }
 0x509   : > { %2979 = vmatpush3.bf16.msra.mxu0 %v3208_v57 }
 0x50a   : > { %2980 = vmatprep.subr.bf16.mxu0 %v3320_v47 }
 0x50b   : > { %2961 = vmatpush3.bf16.msra.mxu1 %v3201_v50  ;;  %v2121_v50 = vld [vmem:[%s3613_s2 + $0x7] sm:$0x1] }
 0x50c   : > { %2962 = vmatprep.subr.bf16.mxu1 %v3320_v47 }
 0x50d   : > { %2981 = vmatpush3.bf16.msra.mxu0 %v3209_v58 }
 0x50e   : > { %2982 = vmatprep.subr.bf16.mxu0 %v3320_v47 }
 0x50f   : > { %2963 = vmatpush3.bf16.msra.mxu1 %v3202_v51 }
 0x510   : > { %2964 = vmatprep.subr.bf16.mxu1 %v3320_v47 }
 0x511   : > { %2983 = vmatpush3.bf16.msra.mxu0 %v3210_v33 }
 0x512   : > { %2984 = vmatprep.subr.bf16.mxu0 %v3320_v47 }
 0x513   : > { %2965 = vmatpush3.bf16.msra.mxu1 %v3203_v52 }
 0x514   : > { %2990 = vmatprep.subr.bf16.mxu1 %v3320_v47 }
 0x515   : > { %2985 = vmatpush3.bf16.msra.mxu0 %v3211_v34 }
 0x5c9   : > { %v2781_v59 = vpop.f32.mrb[32].mxu1  ;;  %v2948_v60 = vpop.f32.mrb[20].mxu0 }
 0x5ca   : > { %v2782_v61 = vpop.f32.mrb[33].mxu1  ;;  %v1969_v63 = vpop.f32.mrb[21].mxu0 }
 0x5cb   : > { %v2783_v0 = vadd.f32 %v2782_v61, %v2781_v59  ;;  %v2784_v1 = vpop.f32.mrb[34].mxu1  ;;  %v2949_v2 = vpop.f32.mrb[22].mxu0 }
 0x5cc   : > { %v2785_v4 = vpop.f32.mrb[35].mxu1  ;;  %v1972_v5 = vpop.f32.mrb[23].mxu0 }
 0x5cd   : > { %v1922_v6 = vadd.f32 %v2783_v0, %v2544_v62  ;;  %v2786_v8 = vadd.f32 %v2785_v4, %v2784_v1 }
 0x5cf   : > { %v1970_v9 = vadd.f32 %v1969_v63, %v1922_v6  ;;  %v1925_v10 = vadd.f32 %v2786_v8, %v2544_v62 }
 0x5d1   : > { %v1973_v11 = vadd.f32 %v1972_v5, %v1925_v10  ;;  %v2787_v12 = vpop.f32.mrb[36].mxu1  ;;  %v1983_v14 = vmax.f32 %v1970_v9, 0.0 }
 0x5d2   : > { %v2788_v13 = vpop.f32.mrb[37].mxu1 }
 0x5d3   : > { %v1984_v15 = vmax.f32 %v1973_v11, 0.0  ;;  %v2789_v16 = vadd.f32 %v2788_v13, %v2787_v12  ;;  %v2790_v17 = vpop.f32.mrb[38].mxu1 }
 0x5d4   : > { %v2791_v18 = vpop.f32.mrb[39].mxu1 }
 0x5d5   : > { %v1986_v19 = vadd.f32 %v1984_v15, %v1983_v14  ;;  %v1930_v20 = vadd.f32 %v2789_v16, %v2544_v62 }
 0x5d7   : > { %v1978_v21 = vadd.f32 %v2948_v60, %v1930_v20 }
 0x5d9   : > { %v1985_v22 = vmax.f32 %v1978_v21, 0.0 }
 0x5db   : > { %v1987_v23 = vsel %vm320_vm0, %v1985_v22, 0.0 }
 0x5dc   : > { %v1988_v24 = vadd.f32 %v1987_v23, %v1986_v19 }
 0x5de   : > { %v1989_v25 = vrot.slane %v1988_v24, 4 }
 0x5e0   : > { %v1990_v26 = vadd.f32 %v1989_v25, %v1988_v24 }
 0x5e2   : > { %v1991_v27 = vrot.slane %v1990_v26, 2 }
 0x5e4   : > { %v1992_v28 = vadd.f32 %v1991_v27, %v1990_v26 }
 0x5e6   : > { %v1993_v29 = vrot.slane %v1992_v28, 1 }
 0x5e8   : > { %v1994_v30 = vadd.f32 %v1993_v29, %v1992_v28 }
 0x5ea   : > { %v1996_v31 = vmul.f32 0.05882353, %v1994_v30 }
 0x5ec   : > { %v1997_v32 = vpack.c.bf16 %v1996_v31, %v1996_v31 }
 0x5ee   : > { %2967 = vmatmul.mubr.bf16.vlgmr.msra.gmra.mrb[40].mxu1 %v1997_v32 }
 0x5ef   : > { %3006 = vmatprep.mubr.msk.bf16.mxu1 %vm3321_vm8, %v3320_v47  ;;  %2991 = vmatpush3.bf16.msra.mxu1 %v3212_v35 }
 0x5f0   : > { %2992 = vmatprep.subr.bf16.mxu1 %v3320_v47 }
 0x5f3   : > { %2993 = vmatpush3.bf16.msra.mxu1 %v3213_v36 }
 0x5f4   : > { %2994 = vmatprep.subr.bf16.mxu1 %v3320_v47 }
 0x5f7   : > { %2995 = vmatpush3.bf16.msra.mxu1 %v3214_v37 }
 0x5f8   : > { %2996 = vmatprep.subr.bf16.mxu1 %v3320_v47 }
 0x5fb   : > { %2997 = vmatpush3.bf16.msra.mxu1 %v3215_v38 }
 0x5fc   : > { %2998 = vmatprep.subr.bf16.mxu1 %v3320_v47 }
 0x5ff   : > { %2999 = vmatpush3.bf16.msra.mxu1 %v3216_v39 }
 0x600   : > { %3000 = vmatprep.subr.bf16.mxu1 %v3320_v47 }
 0x603   : > { %3001 = vmatpush3.bf16.msra.mxu1 %v3217_v40 }
 0x604   : > { %3002 = vmatprep.subr.bf16.mxu1 %v3320_v47 }
 0x607   : > { %3003 = vmatpush3.bf16.msra.mxu1 %v3218_v49 }
 0x608   : > { %3004 = vmatprep.subr.bf16.mxu1 %v3320_v47  ;;  %v2228_v47 = vld [vmem:[%s3613_s2 + $0x8] sm:$0x1] }
 0x60b   : > { %3005 = vmatpush3.bf16.msra.mxu1 %v3219_v7 }
 0x6c1   : > { %v2097_v42 = vpop.f32.mrb[40].mxu1 }
 0x6c2   : > { %v2098_v43 = vadd.f32 %v2097_v42, %v2014_v41  ;;  %v2968_v44 = vpop.f32.mrb[41].mxu1 }
 0x6c3   : > { %v2100_v45 = vpop.f32.mrb[42].mxu1 }
 0x6c4   : > { %v2103_v46 = vmax.f32 %v2098_v43, 0.0  ;;  %v2969_v48 = vpop.f32.mrb[43].mxu1 }
 0x6c6   : > { %v2104_v3 = vpack.c.bf16 %v2103_v46, %v2103_v46 }
 0x6c8   : > { %2987 = vmatmul.mubr.bf16.vlgmr.msra.gmra.mrb[24].mxu0 %v2104_v3 }
 0x79b   : > { %v2204_v51 = vpop.f32.mrb[24].mxu0 }
 0x79c   : > { %v2205_v52 = vadd.f32 %v2204_v51, %v2121_v50  ;;  %v2988_v53 = vpop.f32.mrb[25].mxu0 }
 0x79d   : > { %v2207_v54 = vpop.f32.mrb[26].mxu0 }
 0x79e   : > { %v2210_v55 = vmax.f32 %v2205_v52, 0.0  ;;  %v2989_v56 = vpop.f32.mrb[27].mxu0 }
 0x7a0   : > { %v2211_v57 = vpack.c.bf16 %v2210_v55, %v2210_v55 }
 0x7a2   : > { %3007 = vmatmul.mubr.bf16.vlgmr.msra.gmra.mrb[44].mxu1 %v2211_v57 }
 0x875   : > { %v2311_v58 = vpop.f32.mrb[44].mxu1 }
 0x876   : > { %v2312_v59 = vadd.f32 %v2311_v58, %v2228_v47  ;;  %v3008_v60 = vpop.f32.mrb[45].mxu1 }
 0x877   : > { %v2314_v61 = vpop.f32.mrb[46].mxu1 }
 0x878   : > { %2317 = vst [vmem:[%s177_s29] sm:$0x1] %v2312_v59  ;;  %v3009_v62 = vpop.f32.mrb[47].mxu1 }
 0x879   : > { %3261 = shalt.err (!%p3258_p7)
}
 0x87a   : > { %s3262_s11 = scalar_lea.hbm %s3569_s6, 16  ;;  %s3266_s20 = scalar_lea.hbm %s3614_s3, 32 }
 0x87b   : > { %p3263_p8 = scmp.ne.s32.totalorder %s3569_s6, %s3262_s11  ;;  %p3267_p1 = scmp.lt.u32.totalorder %s3569_s6, %s3614_s3 }
 0x87c   : > { %p3268_p0 = scmp.lt.u32.totalorder %s3266_s20, %s3262_s11  ;;  %p3270_p6 = scmp.lt.u32.totalorder %s3262_s11, %s3569_s6 }
 0x87d   : > { %p3264_p11 = pnand %p3263_p8, %p3629_p9 }
 0x87e   : > { %p3269_p5 = por %p3268_p0, %p3267_p1 }
 0x87f   : > { %p3265_p13 = pneg %p3264_p11 }
 0x880   : > { %p3271_p10 = por %p3270_p6, %p3269_p5 }
 0x882   : > { %p3272_p12 = pnand %p3271_p10, %p3265_p13 }
 0x884   : > { %3275 = shalt.err (!%p3272_p12)
}
 0x885   : > { %3015 = dma.vmem_to_hbm [thread:$0]  (%p3629_p9), %s3571_s30, 16, %s3569_s6, %s2319_s7  }
 0x886 PF: > { %p3027_p2 = scmp.ge.s32.totalorder %s3314_s15, 2  ;;  %s2343_s26 = sand.u32 1, %s3302_s12  }
 0x887   : > { %p3630_p3 = scmp.ne.s32.totalorder %s3619_s23, 0  ;;  %s2344_s27 = scalar_lea.sflag [#allocation4], %s2343_s26 }
 0x889   : > { %p3022_p4 = pnand %p3027_p2, %p3630_p3 }
 0x88b   : > { %3297 = dma.done.wait (!%p3022_p4), %s2344_s27, 16  }
 0x88c   : > { %3299 = vsyncadd (!%p3022_p4), %s2344_s27, 4294967280  ;;  %p14_p7 = scmp.ge.s32.totalorder %s3368_s18, 4   ;;  %s3631_s12 = smov %s3306_s13 }
 0x88d   : > { %s3632_s13 = smov %s3310_s14  ;;  %s3633_s14 = smov %s3379_s21 }
 0x88e   : > { %s3634_s15 = smov %s3368_s18  ;;  %16 = sbr.rel (!%p14_p7) target bundleno = 4 (0x4), region = 72 }
 0x895   :  { %2348 = vsyncpa [#allocation3], 1 }
 0x896   :  { %2350 = vsyncpa [#allocation3 + $0x1], 1 }
 0x897   :  { %2351 = vsyncpa [#allocation4], 1 }
 0x898   :  { %2353 = vsyncpa [#allocation4 + $0x1], 1 }

</bundles_post_ra>
